<compile_context>
chip_gen: v7x
topology: tpu7x:2x2x1
jax: 0.10.0
libtpu: 0.0.40
codegen_flags: <defaults>
</compile_context>

<pallas_src>
import functools

import jax
import jax.numpy as jnp
from jax.experimental import pallas as pl
from jax.experimental.pallas import tpu as pltpu


def _energy_kernel(x_ref, y_ref, g_ref, w1y_ref, w1x_ref, w2_ref, b2_ref,
                   w3_ref, b3_ref, w4_ref, b4_ref, o_ref):
    """Transposed MLP: rows on lanes, features/hidden units on sublanes."""
    w1y = w1y_ref[...]            # (hid, 1)
    w1x = w1x_ref[...]            # (hid, 1)
    w2 = w2_ref[...]              # (hid, hid)  PyTorch (out, in) layout
    b2 = b2_ref[...]              # (hid, 1)
    w3 = w3_ref[...]              # (hid, hid)
    b3 = b3_ref[...]              # (hid, 1)
    w4 = w4_ref[...]              # (1, hid)
    b4 = b4_ref[...]              # (1, 1)

    tile_sb = x_ref.shape[0]
    for s in range(tile_sb):      # static unroll over (s*b) rows in this block
        yt = y_ref[s]             # (1, tile_t)
        xt = x_ref[s]             # (1, tile_t)
        g = g_ref[s]              # (hid, 1) = W1[:, 2:] @ phi[s,b] + b1
        # Layer 1 (folded broadcast/concat): VPU broadcasts, no feature matrix.
        h = jnp.maximum(w1y * yt + w1x * xt + g, 0.0)                         # (hid, tile_t)
        # Layers 2-3 on the MXU with the large dim (tile_t) as the MXU N-dim.
        h = jnp.maximum(jnp.dot(w2, h, preferred_element_type=jnp.float32) + b2, 0.0)
        h = jnp.maximum(jnp.dot(w3, h, preferred_element_type=jnp.float32) + b3, 0.0)
        o = jnp.dot(w4, h, preferred_element_type=jnp.float32) + b4           # (1, tile_t)
        o_ref[s] = o.astype(o_ref.dtype)                                      # lane-dense store


def _round_up(v, m):
    return ((v + m - 1) // m) * m


@functools.partial(jax.jit, static_argnames=("tile_sb", "tile_t"))
def decoder_forward(x, y, phi, params, *, tile_sb=8, tile_t=1024):
    """Pallas equivalent of Decoder.forward. Returns (energy, None).

    x, y: (B, T, 1); phi: (S, B, L). Params in PyTorch Linear layout:
    w (out, in), b (out,).
    """
    w1, b1, w2, b2, w3, b3, w4, b4 = params
    S, _, L = phi.shape
    B, T, sd = x.shape
    assert sd == 1, "Decoder expects sample_dim == 1 (fc_energy input dim = latent_dim + 2)"
    hid = w2.shape[0]
    SB = S * B

    # Fold the phi-dependent (per (s,b), constant over t) part of layer 1 into a
    # tiny precompute: g = W1[:, 2:] @ phi + b1.  Concat order is [y, x, z].
    w1y = w1[:, 0:1].astype(jnp.float32)
    w1x = w1[:, 1:2].astype(jnp.float32)
    w1z = w1[:, 2:].astype(jnp.float32)
    g = phi.reshape(SB, L).astype(jnp.float32) @ w1z.T + b1.astype(jnp.float32)   # (SB, hid)

    # Tiling: (s*b) rows on the (unconstrained) leading axis, t on lanes.
    tile_t_eff = min(tile_t, _round_up(T, 128))
    t_pad = _round_up(T, tile_t_eff)
    tile_sb_eff = min(tile_sb, SB)
    sb_pad = _round_up(SB, tile_sb_eff)

    def prep_xy(a):               # (B, T, 1) -> (sb_pad, 1, t_pad) f32
        a2 = jnp.broadcast_to(a[None, :, :, 0], (S, B, T)).reshape(SB, T)
        a2 = a2.astype(jnp.float32)
        a2 = jnp.pad(a2, ((0, sb_pad - SB), (0, t_pad - T)))
        return a2[:, None, :]

    xr = prep_xy(x)
    yr = prep_xy(y)
    gr = jnp.pad(g, ((0, sb_pad - SB), (0, 0)))[:, :, None]                 # (sb_pad, hid, 1)

    f32 = lambda a: a.astype(jnp.float32)
    grid = (sb_pad // tile_sb_eff, t_pad // tile_t_eff)
    const = lambda i, j: (0, 0)

    out = pl.pallas_call(
        _energy_kernel,
        out_shape=jax.ShapeDtypeStruct((sb_pad, 1, t_pad), jnp.float32),
        grid_spec=pltpu.PrefetchScalarGridSpec(
            num_scalar_prefetch=0,
            grid=grid,
            in_specs=[
                pl.BlockSpec((tile_sb_eff, 1, tile_t_eff), lambda i, j: (i, 0, j)),  # x
                pl.BlockSpec((tile_sb_eff, 1, tile_t_eff), lambda i, j: (i, 0, j)),  # y
                pl.BlockSpec((tile_sb_eff, hid, 1), lambda i, j: (i, 0, 0)),         # g
                pl.BlockSpec((hid, 1), const),      # w1y
                pl.BlockSpec((hid, 1), const),      # w1x
                pl.BlockSpec((hid, hid), const),    # w2
                pl.BlockSpec((hid, 1), const),      # b2
                pl.BlockSpec((hid, hid), const),    # w3
                pl.BlockSpec((hid, 1), const),      # b3
                pl.BlockSpec((1, hid), const),      # w4
                pl.BlockSpec((1, 1), const),        # b4
            ],
            out_specs=pl.BlockSpec((tile_sb_eff, 1, tile_t_eff), lambda i, j: (i, 0, j)),
        ),
        compiler_params=pltpu.CompilerParams(
            dimension_semantics=("parallel", "parallel")),
    )(xr, yr, gr, w1y, w1x, f32(w2), f32(b2)[:, None],
      f32(w3), f32(b3)[:, None], f32(w4), f32(b4).reshape(1, 1))

    e = out[:SB, 0, :T].reshape(S, B, T, 1).astype(x.dtype)
    return e, None


def init_params(key, latent_dim, hid_dim):
    """Deterministic Linear params in PyTorch layout: w (out, in), b (out,)."""
    dims = [(latent_dim + 2, hid_dim), (hid_dim, hid_dim),
            (hid_dim, hid_dim), (hid_dim, 1)]
    params = []
    for fan_in, fan_out in dims:
        key, kw, kb = jax.random.split(key, 3)
        bound = 1.0 / jnp.sqrt(fan_in)
        w = jax.random.uniform(kw, (fan_out, fan_in), jnp.float32, -bound, bound)
        b = jax.random.uniform(kb, (fan_out,), jnp.float32, -bound, bound)
        params += [w, b]
    return tuple(params)


def reference_forward(x, y, phi, params):
    """Pure-JAX reference for correctness check (mirrors the PyTorch module)."""
    w1, b1, w2, b2, w3, b3, w4, b4 = params
    S = phi.shape[0]
    B, T, sd = x.shape
    x_e = jnp.broadcast_to(x[None], (S, B, T, sd))
    y_e = jnp.broadcast_to(y[None], (S, B, T, sd))
    z = jnp.broadcast_to(phi[:, :, None, :], (S, B, T, phi.shape[-1]))
    h = jnp.concatenate([y_e, x_e, z], axis=-1)
    h = jnp.maximum(h @ w1.T + b1, 0.0)
    h = jnp.maximum(h @ w2.T + b2, 0.0)
    h = jnp.maximum(h @ w3.T + b3, 0.0)
    return h @ w4.T + b4


if __name__ == "__main__":
    # Small shapes consistent with the module (sample_dim must be 1:
    # fc_energy input dim is latent_dim + 2 = 2*sample_dim + latent_dim).
    num_phi_samples = 3
    batch_size = 2
    task_dim = 8
    sample_dim = 1
    latent_dim = 6
    hid_dim = 32

    key = jax.random.PRNGKey(0)
    kx, ky, kp, kparam = jax.random.split(key, 4)
    x = jax.random.normal(kx, (batch_size, task_dim, sample_dim), jnp.float32)
    y = jax.random.normal(ky, (batch_size, task_dim, sample_dim), jnp.float32)
    phi = jax.random.normal(kp, (num_phi_samples, batch_size, latent_dim), jnp.float32)

    params = init_params(kparam, latent_dim, hid_dim)

    e, none_out = decoder_forward(x, y, phi, params)
    e = jax.block_until_ready(e)

    ref = reference_forward(x, y, phi, params)
    assert e.shape == (num_phi_samples, batch_size, task_dim, 1), e.shape
    assert none_out is None
    assert jnp.allclose(e, ref, atol=1e-4, rtol=1e-4), float(jnp.max(jnp.abs(e - ref)))

    print("KERNEL_OK")
</pallas_src>

<mosaic_0001>
module attributes {stable_mosaic.version = 11 : i64} {
  func.func @_energy_kernel(%arg0: i32, %arg1: i32, %arg2: memref<6x1x128xf32, #tpu.memory_space<vmem>>, %arg3: memref<6x1x128xf32, #tpu.memory_space<vmem>>, %arg4: memref<6x32x1xf32, #tpu.memory_space<vmem>>, %arg5: memref<32x1xf32, #tpu.memory_space<vmem>>, %arg6: memref<32x1xf32, #tpu.memory_space<vmem>>, %arg7: memref<32x32xf32, #tpu.memory_space<vmem>>, %arg8: memref<32x1xf32, #tpu.memory_space<vmem>>, %arg9: memref<32x32xf32, #tpu.memory_space<vmem>>, %arg10: memref<32x1xf32, #tpu.memory_space<vmem>>, %arg11: memref<1x32xf32, #tpu.memory_space<vmem>>, %arg12: memref<1x1xf32, #tpu.memory_space<vmem>>, %arg13: memref<6x1x128xf32, #tpu.memory_space<vmem>>) attributes {dimension_semantics = [#tpu.dimension_semantics<parallel>, #tpu.dimension_semantics<parallel>], iteration_bounds = array<i64: 1, 1>, scalar_prefetch = 0 : i64, scratch_operands = 0 : i64, tpu.core_type = #tpu.core_type<tc>, window_params = [{transform_indices = @transform_0, window_bounds = array<i64: 6, 1, 128>}, {transform_indices = @transform_1, window_bounds = array<i64: 6, 1, 128>}, {transform_indices = @transform_2, window_bounds = array<i64: 6, 32, 1>}, {pipeline_mode = #tpu.pipeline_mode<synchronous>, transform_indices = @transform_3, window_bounds = array<i64: 32, 1>}, {pipeline_mode = #tpu.pipeline_mode<synchronous>, transform_indices = @transform_4, window_bounds = array<i64: 32, 1>}, {pipeline_mode = #tpu.pipeline_mode<synchronous>, transform_indices = @transform_5, window_bounds = array<i64: 32, 32>}, {pipeline_mode = #tpu.pipeline_mode<synchronous>, transform_indices = @transform_6, window_bounds = array<i64: 32, 1>}, {pipeline_mode = #tpu.pipeline_mode<synchronous>, transform_indices = @transform_7, window_bounds = array<i64: 32, 32>}, {pipeline_mode = #tpu.pipeline_mode<synchronous>, transform_indices = @transform_8, window_bounds = array<i64: 32, 1>}, {pipeline_mode = #tpu.pipeline_mode<synchronous>, transform_indices = @transform_9, window_bounds = array<i64: 1, 32>}, {pipeline_mode = #tpu.pipeline_mode<synchronous>, transform_indices = @transform_10, window_bounds = array<i64: 1, 1>}, {transform_indices = @transform_11, window_bounds = array<i64: 6, 1, 128>}]} {
    %c0 = arith.constant 0 : index
    %c0_0 = arith.constant 0 : index
    %0 = vector.load %arg5[%c0, %c0_0] : memref<32x1xf32, #tpu.memory_space<vmem>>, vector<32x1xf32>
    %c0_1 = arith.constant 0 : index
    %c0_2 = arith.constant 0 : index
    %1 = vector.load %arg6[%c0_1, %c0_2] : memref<32x1xf32, #tpu.memory_space<vmem>>, vector<32x1xf32>
    %c0_3 = arith.constant 0 : index
    %c0_4 = arith.constant 0 : index
    %2 = vector.load %arg7[%c0_3, %c0_4] : memref<32x32xf32, #tpu.memory_space<vmem>>, vector<32x32xf32>
    %c0_5 = arith.constant 0 : index
    %c0_6 = arith.constant 0 : index
    %3 = vector.load %arg8[%c0_5, %c0_6] : memref<32x1xf32, #tpu.memory_space<vmem>>, vector<32x1xf32>
    %c0_7 = arith.constant 0 : index
    %c0_8 = arith.constant 0 : index
    %4 = vector.load %arg9[%c0_7, %c0_8] : memref<32x32xf32, #tpu.memory_space<vmem>>, vector<32x32xf32>
    %c0_9 = arith.constant 0 : index
    %c0_10 = arith.constant 0 : index
    %5 = vector.load %arg10[%c0_9, %c0_10] : memref<32x1xf32, #tpu.memory_space<vmem>>, vector<32x1xf32>
    %c0_11 = arith.constant 0 : index
    %c0_12 = arith.constant 0 : index
    %6 = vector.load %arg11[%c0_11, %c0_12] : memref<1x32xf32, #tpu.memory_space<vmem>>, vector<1x32xf32>
    %c0_13 = arith.constant 0 : index
    %c0_14 = arith.constant 0 : index
    %7 = vector.load %arg12[%c0_13, %c0_14] : memref<1x1xf32, #tpu.memory_space<vmem>>, vector<1x1xf32>
    %c0_15 = arith.constant 0 : index
    %c0_16 = arith.constant 0 : index
    %c0_17 = arith.constant 0 : index
    %8 = vector.load %arg3[%c0_15, %c0_16, %c0_17] : memref<6x1x128xf32, #tpu.memory_space<vmem>>, vector<1x1x128xf32>
    %9 = vector.shape_cast %8 : vector<1x1x128xf32> to vector<1x128xf32>
    %c0_18 = arith.constant 0 : index
    %c0_19 = arith.constant 0 : index
    %c0_20 = arith.constant 0 : index
    %10 = vector.load %arg2[%c0_18, %c0_19, %c0_20] : memref<6x1x128xf32, #tpu.memory_space<vmem>>, vector<1x1x128xf32>
    %11 = vector.shape_cast %10 : vector<1x1x128xf32> to vector<1x128xf32>
    %c0_21 = arith.constant 0 : index
    %c0_22 = arith.constant 0 : index
    %c0_23 = arith.constant 0 : index
    %12 = vector.load %arg4[%c0_21, %c0_22, %c0_23] : memref<6x32x1xf32, #tpu.memory_space<vmem>>, vector<1x32x1xf32>
    %13 = vector.shape_cast %12 : vector<1x32x1xf32> to vector<32x1xf32>
    %14 = vector.broadcast %0 : vector<32x1xf32> to vector<32x128xf32>
    %15 = vector.broadcast %9 : vector<1x128xf32> to vector<32x128xf32>
    %16 = arith.mulf %14, %15 : vector<32x128xf32>
    %17 = vector.broadcast %1 : vector<32x1xf32> to vector<32x128xf32>
    %18 = vector.broadcast %11 : vector<1x128xf32> to vector<32x128xf32>
    %19 = arith.mulf %17, %18 : vector<32x128xf32>
    %20 = arith.addf %16, %19 : vector<32x128xf32>
    %21 = vector.broadcast %13 : vector<32x1xf32> to vector<32x128xf32>
    %22 = arith.addf %20, %21 : vector<32x128xf32>
    %cst = arith.constant 0.000000e+00 : f32
    %23 = vector.broadcast %cst : f32 to vector<32x128xf32>
    %24 = arith.maximumf %22, %23 : vector<32x128xf32>
    %cst_24 = arith.constant dense<0.000000e+00> : vector<32x128xf32>
    %25 = tpu.matmul %2, %24, %cst_24 {dimension_numbers = #tpu.dot_dimension_numbers<[1], [0], [0], [1], [0, 0, 1, 1], [], []>} : vector<32x32xf32>, vector<32x128xf32>, vector<32x128xf32> -> vector<32x128xf32>
    %26 = vector.broadcast %3 : vector<32x1xf32> to vector<32x128xf32>
    %27 = arith.addf %25, %26 : vector<32x128xf32>
    %cst_25 = arith.constant 0.000000e+00 : f32
    %28 = vector.broadcast %cst_25 : f32 to vector<32x128xf32>
    %29 = arith.maximumf %27, %28 : vector<32x128xf32>
    %cst_26 = arith.constant dense<0.000000e+00> : vector<32x128xf32>
    %30 = tpu.matmul %4, %29, %cst_26 {dimension_numbers = #tpu.dot_dimension_numbers<[1], [0], [0], [1], [0, 0, 1, 1], [], []>} : vector<32x32xf32>, vector<32x128xf32>, vector<32x128xf32> -> vector<32x128xf32>
    %31 = vector.broadcast %5 : vector<32x1xf32> to vector<32x128xf32>
    %32 = arith.addf %30, %31 : vector<32x128xf32>
    %cst_27 = arith.constant 0.000000e+00 : f32
    %33 = vector.broadcast %cst_27 : f32 to vector<32x128xf32>
    %34 = arith.maximumf %32, %33 : vector<32x128xf32>
    %cst_28 = arith.constant dense<0.000000e+00> : vector<1x128xf32>
    %35 = tpu.matmul %6, %34, %cst_28 {dimension_numbers = #tpu.dot_dimension_numbers<[1], [0], [0], [1], [0, 0, 1, 1], [], []>} : vector<1x32xf32>, vector<32x128xf32>, vector<1x128xf32> -> vector<1x128xf32>
    %36 = vector.broadcast %7 : vector<1x1xf32> to vector<1x128xf32>
    %37 = arith.addf %35, %36 : vector<1x128xf32>
    %c0_29 = arith.constant 0 : index
    %c0_30 = arith.constant 0 : index
    %c0_31 = arith.constant 0 : index
    %38 = vector.load %arg13[%c0_29, %c0_30, %c0_31] : memref<6x1x128xf32, #tpu.memory_space<vmem>>, vector<1x1x128xf32>
    %39 = vector.shape_cast %38 : vector<1x1x128xf32> to vector<1x128xf32>
    %40 = vector.shape_cast %37 : vector<1x128xf32> to vector<1x1x128xf32>
    tpu.vector_store %arg13[%c0_29, %c0_30, %c0_31], %40 {strides = array<i32>} : memref<6x1x128xf32, #tpu.memory_space<vmem>>, vector<1x1x128xf32>,
    %c1 = arith.constant 1 : index
    %c0_32 = arith.constant 0 : index
    %c0_33 = arith.constant 0 : index
    %41 = vector.load %arg3[%c1, %c0_32, %c0_33] : memref<6x1x128xf32, #tpu.memory_space<vmem>>, vector<1x1x128xf32>
    %42 = vector.shape_cast %41 : vector<1x1x128xf32> to vector<1x128xf32>
    %c1_34 = arith.constant 1 : index
    %c0_35 = arith.constant 0 : index
    %c0_36 = arith.constant 0 : index
    %43 = vector.load %arg2[%c1_34, %c0_35, %c0_36] : memref<6x1x128xf32, #tpu.memory_space<vmem>>, vector<1x1x128xf32>
    %44 = vector.shape_cast %43 : vector<1x1x128xf32> to vector<1x128xf32>
    %c1_37 = arith.constant 1 : index
    %c0_38 = arith.constant 0 : index
    %c0_39 = arith.constant 0 : index
    %45 = vector.load %arg4[%c1_37, %c0_38, %c0_39] : memref<6x32x1xf32, #tpu.memory_space<vmem>>, vector<1x32x1xf32>
    %46 = vector.shape_cast %45 : vector<1x32x1xf32> to vector<32x1xf32>
    %47 = vector.broadcast %0 : vector<32x1xf32> to vector<32x128xf32>
    %48 = vector.broadcast %42 : vector<1x128xf32> to vector<32x128xf32>
    %49 = arith.mulf %47, %48 : vector<32x128xf32>
    %50 = vector.broadcast %1 : vector<32x1xf32> to vector<32x128xf32>
    %51 = vector.broadcast %44 : vector<1x128xf32> to vector<32x128xf32>
    %52 = arith.mulf %50, %51 : vector<32x128xf32>
    %53 = arith.addf %49, %52 : vector<32x128xf32>
    %54 = vector.broadcast %46 : vector<32x1xf32> to vector<32x128xf32>
    %55 = arith.addf %53, %54 : vector<32x128xf32>
    %cst_40 = arith.constant 0.000000e+00 : f32
    %56 = vector.broadcast %cst_40 : f32 to vector<32x128xf32>
    %57 = arith.maximumf %55, %56 : vector<32x128xf32>
    %cst_41 = arith.constant dense<0.000000e+00> : vector<32x128xf32>
    %58 = tpu.matmul %2, %57, %cst_41 {dimension_numbers = #tpu.dot_dimension_numbers<[1], [0], [0], [1], [0, 0, 1, 1], [], []>} : vector<32x32xf32>, vector<32x128xf32>, vector<32x128xf32> -> vector<32x128xf32>
    %59 = vector.broadcast %3 : vector<32x1xf32> to vector<32x128xf32>
    %60 = arith.addf %58, %59 : vector<32x128xf32>
    %cst_42 = arith.constant 0.000000e+00 : f32
    %61 = vector.broadcast %cst_42 : f32 to vector<32x128xf32>
    %62 = arith.maximumf %60, %61 : vector<32x128xf32>
    %cst_43 = arith.constant dense<0.000000e+00> : vector<32x128xf32>
    %63 = tpu.matmul %4, %62, %cst_43 {dimension_numbers = #tpu.dot_dimension_numbers<[1], [0], [0], [1], [0, 0, 1, 1], [], []>} : vector<32x32xf32>, vector<32x128xf32>, vector<32x128xf32> -> vector<32x128xf32>
    %64 = vector.broadcast %5 : vector<32x1xf32> to vector<32x128xf32>
    %65 = arith.addf %63, %64 : vector<32x128xf32>
    %cst_44 = arith.constant 0.000000e+00 : f32
    %66 = vector.broadcast %cst_44 : f32 to vector<32x128xf32>
    %67 = arith.maximumf %65, %66 : vector<32x128xf32>
    %cst_45 = arith.constant dense<0.000000e+00> : vector<1x128xf32>
    %68 = tpu.matmul %6, %67, %cst_45 {dimension_numbers = #tpu.dot_dimension_numbers<[1], [0], [0], [1], [0, 0, 1, 1], [], []>} : vector<1x32xf32>, vector<32x128xf32>, vector<1x128xf32> -> vector<1x128xf32>
    %69 = vector.broadcast %7 : vector<1x1xf32> to vector<1x128xf32>
    %70 = arith.addf %68, %69 : vector<1x128xf32>
    %c1_46 = arith.constant 1 : index
    %c0_47 = arith.constant 0 : index
    %c0_48 = arith.constant 0 : index
    %71 = vector.load %arg13[%c1_46, %c0_47, %c0_48] : memref<6x1x128xf32, #tpu.memory_space<vmem>>, vector<1x1x128xf32>
    %72 = vector.shape_cast %71 : vector<1x1x128xf32> to vector<1x128xf32>
    %73 = vector.shape_cast %70 : vector<1x128xf32> to vector<1x1x128xf32>
    tpu.vector_store %arg13[%c1_46, %c0_47, %c0_48], %73 {strides = array<i32>} : memref<6x1x128xf32, #tpu.memory_space<vmem>>, vector<1x1x128xf32>,
    %c2 = arith.constant 2 : index
    %c0_49 = arith.constant 0 : index
    %c0_50 = arith.constant 0 : index
    %74 = vector.load %arg3[%c2, %c0_49, %c0_50] : memref<6x1x128xf32, #tpu.memory_space<vmem>>, vector<1x1x128xf32>
    %75 = vector.shape_cast %74 : vector<1x1x128xf32> to vector<1x128xf32>
    %c2_51 = arith.constant 2 : index
    %c0_52 = arith.constant 0 : index
    %c0_53 = arith.constant 0 : index
    %76 = vector.load %arg2[%c2_51, %c0_52, %c0_53] : memref<6x1x128xf32, #tpu.memory_space<vmem>>, vector<1x1x128xf32>
    %77 = vector.shape_cast %76 : vector<1x1x128xf32> to vector<1x128xf32>
    %c2_54 = arith.constant 2 : index
    %c0_55 = arith.constant 0 : index
    %c0_56 = arith.constant 0 : index
    %78 = vector.load %arg4[%c2_54, %c0_55, %c0_56] : memref<6x32x1xf32, #tpu.memory_space<vmem>>, vector<1x32x1xf32>
    %79 = vector.shape_cast %78 : vector<1x32x1xf32> to vector<32x1xf32>
    %80 = vector.broadcast %0 : vector<32x1xf32> to vector<32x128xf32>
    %81 = vector.broadcast %75 : vector<1x128xf32> to vector<32x128xf32>
    %82 = arith.mulf %80, %81 : vector<32x128xf32>
    %83 = vector.broadcast %1 : vector<32x1xf32> to vector<32x128xf32>
    %84 = vector.broadcast %77 : vector<1x128xf32> to vector<32x128xf32>
    %85 = arith.mulf %83, %84 : vector<32x128xf32>
    %86 = arith.addf %82, %85 : vector<32x128xf32>
    %87 = vector.broadcast %79 : vector<32x1xf32> to vector<32x128xf32>
    %88 = arith.addf %86, %87 : vector<32x128xf32>
    %cst_57 = arith.constant 0.000000e+00 : f32
    %89 = vector.broadcast %cst_57 : f32 to vector<32x128xf32>
    %90 = arith.maximumf %88, %89 : vector<32x128xf32>
    %cst_58 = arith.constant dense<0.000000e+00> : vector<32x128xf32>
    %91 = tpu.matmul %2, %90, %cst_58 {dimension_numbers = #tpu.dot_dimension_numbers<[1], [0], [0], [1], [0, 0, 1, 1], [], []>} : vector<32x32xf32>, vector<32x128xf32>, vector<32x128xf32> -> vector<32x128xf32>
    %92 = vector.broadcast %3 : vector<32x1xf32> to vector<32x128xf32>
    %93 = arith.addf %91, %92 : vector<32x128xf32>
    %cst_59 = arith.constant 0.000000e+00 : f32
    %94 = vector.broadcast %cst_59 : f32 to vector<32x128xf32>
    %95 = arith.maximumf %93, %94 : vector<32x128xf32>
    %cst_60 = arith.constant dense<0.000000e+00> : vector<32x128xf32>
    %96 = tpu.matmul %4, %95, %cst_60 {dimension_numbers = #tpu.dot_dimension_numbers<[1], [0], [0], [1], [0, 0, 1, 1], [], []>} : vector<32x32xf32>, vector<32x128xf32>, vector<32x128xf32> -> vector<32x128xf32>
    %97 = vector.broadcast %5 : vector<32x1xf32> to vector<32x128xf32>
    %98 = arith.addf %96, %97 : vector<32x128xf32>
    %cst_61 = arith.constant 0.000000e+00 : f32
    %99 = vector.broadcast %cst_61 : f32 to vector<32x128xf32>
    %100 = arith.maximumf %98, %99 : vector<32x128xf32>
    %cst_62 = arith.constant dense<0.000000e+00> : vector<1x128xf32>
    %101 = tpu.matmul %6, %100, %cst_62 {dimension_numbers = #tpu.dot_dimension_numbers<[1], [0], [0], [1], [0, 0, 1, 1], [], []>} : vector<1x32xf32>, vector<32x128xf32>, vector<1x128xf32> -> vector<1x128xf32>
    %102 = vector.broadcast %7 : vector<1x1xf32> to vector<1x128xf32>
    %103 = arith.addf %101, %102 : vector<1x128xf32>
    %c2_63 = arith.constant 2 : index
    %c0_64 = arith.constant 0 : index
    %c0_65 = arith.constant 0 : index
    %104 = vector.load %arg13[%c2_63, %c0_64, %c0_65] : memref<6x1x128xf32, #tpu.memory_space<vmem>>, vector<1x1x128xf32>
    %105 = vector.shape_cast %104 : vector<1x1x128xf32> to vector<1x128xf32>
    %106 = vector.shape_cast %103 : vector<1x128xf32> to vector<1x1x128xf32>
    tpu.vector_store %arg13[%c2_63, %c0_64, %c0_65], %106 {strides = array<i32>} : memref<6x1x128xf32, #tpu.memory_space<vmem>>, vector<1x1x128xf32>,
    %c3 = arith.constant 3 : index
    %c0_66 = arith.constant 0 : index
    %c0_67 = arith.constant 0 : index
    %107 = vector.load %arg3[%c3, %c0_66, %c0_67] : memref<6x1x128xf32, #tpu.memory_space<vmem>>, vector<1x1x128xf32>
    %108 = vector.shape_cast %107 : vector<1x1x128xf32> to vector<1x128xf32>
    %c3_68 = arith.constant 3 : index
    %c0_69 = arith.constant 0 : index
    %c0_70 = arith.constant 0 : index
    %109 = vector.load %arg2[%c3_68, %c0_69, %c0_70] : memref<6x1x128xf32, #tpu.memory_space<vmem>>, vector<1x1x128xf32>
    %110 = vector.shape_cast %109 : vector<1x1x128xf32> to vector<1x128xf32>
    %c3_71 = arith.constant 3 : index
    %c0_72 = arith.constant 0 : index
    %c0_73 = arith.constant 0 : index
    %111 = vector.load %arg4[%c3_71, %c0_72, %c0_73] : memref<6x32x1xf32, #tpu.memory_space<vmem>>, vector<1x32x1xf32>
    %112 = vector.shape_cast %111 : vector<1x32x1xf32> to vector<32x1xf32>
    %113 = vector.broadcast %0 : vector<32x1xf32> to vector<32x128xf32>
    %114 = vector.broadcast %108 : vector<1x128xf32> to vector<32x128xf32>
    %115 = arith.mulf %113, %114 : vector<32x128xf32>
    %116 = vector.broadcast %1 : vector<32x1xf32> to vector<32x128xf32>
    %117 = vector.broadcast %110 : vector<1x128xf32> to vector<32x128xf32>
    %118 = arith.mulf %116, %117 : vector<32x128xf32>
    %119 = arith.addf %115, %118 : vector<32x128xf32>
    %120 = vector.broadcast %112 : vector<32x1xf32> to vector<32x128xf32>
    %121 = arith.addf %119, %120 : vector<32x128xf32>
    %cst_74 = arith.constant 0.000000e+00 : f32
    %122 = vector.broadcast %cst_74 : f32 to vector<32x128xf32>
    %123 = arith.maximumf %121, %122 : vector<32x128xf32>
    %cst_75 = arith.constant dense<0.000000e+00> : vector<32x128xf32>
    %124 = tpu.matmul %2, %123, %cst_75 {dimension_numbers = #tpu.dot_dimension_numbers<[1], [0], [0], [1], [0, 0, 1, 1], [], []>} : vector<32x32xf32>, vector<32x128xf32>, vector<32x128xf32> -> vector<32x128xf32>
    %125 = vector.broadcast %3 : vector<32x1xf32> to vector<32x128xf32>
    %126 = arith.addf %124, %125 : vector<32x128xf32>
    %cst_76 = arith.constant 0.000000e+00 : f32
    %127 = vector.broadcast %cst_76 : f32 to vector<32x128xf32>
    %128 = arith.maximumf %126, %127 : vector<32x128xf32>
    %cst_77 = arith.constant dense<0.000000e+00> : vector<32x128xf32>
    %129 = tpu.matmul %4, %128, %cst_77 {dimension_numbers = #tpu.dot_dimension_numbers<[1], [0], [0], [1], [0, 0, 1, 1], [], []>} : vector<32x32xf32>, vector<32x128xf32>, vector<32x128xf32> -> vector<32x128xf32>
    %130 = vector.broadcast %5 : vector<32x1xf32> to vector<32x128xf32>
    %131 = arith.addf %129, %130 : vector<32x128xf32>
    %cst_78 = arith.constant 0.000000e+00 : f32
    %132 = vector.broadcast %cst_78 : f32 to vector<32x128xf32>
    %133 = arith.maximumf %131, %132 : vector<32x128xf32>
    %cst_79 = arith.constant dense<0.000000e+00> : vector<1x128xf32>
    %134 = tpu.matmul %6, %133, %cst_79 {dimension_numbers = #tpu.dot_dimension_numbers<[1], [0], [0], [1], [0, 0, 1, 1], [], []>} : vector<1x32xf32>, vector<32x128xf32>, vector<1x128xf32> -> vector<1x128xf32>
    %135 = vector.broadcast %7 : vector<1x1xf32> to vector<1x128xf32>
    %136 = arith.addf %134, %135 : vector<1x128xf32>
    %c3_80 = arith.constant 3 : index
    %c0_81 = arith.constant 0 : index
    %c0_82 = arith.constant 0 : index
    %137 = vector.load %arg13[%c3_80, %c0_81, %c0_82] : memref<6x1x128xf32, #tpu.memory_space<vmem>>, vector<1x1x128xf32>
    %138 = vector.shape_cast %137 : vector<1x1x128xf32> to vector<1x128xf32>
    %139 = vector.shape_cast %136 : vector<1x128xf32> to vector<1x1x128xf32>
    tpu.vector_store %arg13[%c3_80, %c0_81, %c0_82], %139 {strides = array<i32>} : memref<6x1x128xf32, #tpu.memory_space<vmem>>, vector<1x1x128xf32>,
    %c4 = arith.constant 4 : index
    %c0_83 = arith.constant 0 : index
    %c0_84 = arith.constant 0 : index
    %140 = vector.load %arg3[%c4, %c0_83, %c0_84] : memref<6x1x128xf32, #tpu.memory_space<vmem>>, vector<1x1x128xf32>
    %141 = vector.shape_cast %140 : vector<1x1x128xf32> to vector<1x128xf32>
    %c4_85 = arith.constant 4 : index
    %c0_86 = arith.constant 0 : index
    %c0_87 = arith.constant 0 : index
    %142 = vector.load %arg2[%c4_85, %c0_86, %c0_87] : memref<6x1x128xf32, #tpu.memory_space<vmem>>, vector<1x1x128xf32>
    %143 = vector.shape_cast %142 : vector<1x1x128xf32> to vector<1x128xf32>
    %c4_88 = arith.constant 4 : index
    %c0_89 = arith.constant 0 : index
    %c0_90 = arith.constant 0 : index
    %144 = vector.load %arg4[%c4_88, %c0_89, %c0_90] : memref<6x32x1xf32, #tpu.memory_space<vmem>>, vector<1x32x1xf32>
    %145 = vector.shape_cast %144 : vector<1x32x1xf32> to vector<32x1xf32>
    %146 = vector.broadcast %0 : vector<32x1xf32> to vector<32x128xf32>
    %147 = vector.broadcast %141 : vector<1x128xf32> to vector<32x128xf32>
    %148 = arith.mulf %146, %147 : vector<32x128xf32>
    %149 = vector.broadcast %1 : vector<32x1xf32> to vector<32x128xf32>
    %150 = vector.broadcast %143 : vector<1x128xf32> to vector<32x128xf32>
    %151 = arith.mulf %149, %150 : vector<32x128xf32>
    %152 = arith.addf %148, %151 : vector<32x128xf32>
    %153 = vector.broadcast %145 : vector<32x1xf32> to vector<32x128xf32>
    %154 = arith.addf %152, %153 : vector<32x128xf32>
    %cst_91 = arith.constant 0.000000e+00 : f32
    %155 = vector.broadcast %cst_91 : f32 to vector<32x128xf32>
    %156 = arith.maximumf %154, %155 : vector<32x128xf32>
    %cst_92 = arith.constant dense<0.000000e+00> : vector<32x128xf32>
    %157 = tpu.matmul %2, %156, %cst_92 {dimension_numbers = #tpu.dot_dimension_numbers<[1], [0], [0], [1], [0, 0, 1, 1], [], []>} : vector<32x32xf32>, vector<32x128xf32>, vector<32x128xf32> -> vector<32x128xf32>
    %158 = vector.broadcast %3 : vector<32x1xf32> to vector<32x128xf32>
    %159 = arith.addf %157, %158 : vector<32x128xf32>
    %cst_93 = arith.constant 0.000000e+00 : f32
    %160 = vector.broadcast %cst_93 : f32 to vector<32x128xf32>
    %161 = arith.maximumf %159, %160 : vector<32x128xf32>
    %cst_94 = arith.constant dense<0.000000e+00> : vector<32x128xf32>
    %162 = tpu.matmul %4, %161, %cst_94 {dimension_numbers = #tpu.dot_dimension_numbers<[1], [0], [0], [1], [0, 0, 1, 1], [], []>} : vector<32x32xf32>, vector<32x128xf32>, vector<32x128xf32> -> vector<32x128xf32>
    %163 = vector.broadcast %5 : vector<32x1xf32> to vector<32x128xf32>
    %164 = arith.addf %162, %163 : vector<32x128xf32>
    %cst_95 = arith.constant 0.000000e+00 : f32
    %165 = vector.broadcast %cst_95 : f32 to vector<32x128xf32>
    %166 = arith.maximumf %164, %165 : vector<32x128xf32>
    %cst_96 = arith.constant dense<0.000000e+00> : vector<1x128xf32>
    %167 = tpu.matmul %6, %166, %cst_96 {dimension_numbers = #tpu.dot_dimension_numbers<[1], [0], [0], [1], [0, 0, 1, 1], [], []>} : vector<1x32xf32>, vector<32x128xf32>, vector<1x128xf32> -> vector<1x128xf32>
    %168 = vector.broadcast %7 : vector<1x1xf32> to vector<1x128xf32>
    %169 = arith.addf %167, %168 : vector<1x128xf32>
    %c4_97 = arith.constant 4 : index
    %c0_98 = arith.constant 0 : index
    %c0_99 = arith.constant 0 : index
    %170 = vector.load %arg13[%c4_97, %c0_98, %c0_99] : memref<6x1x128xf32, #tpu.memory_space<vmem>>, vector<1x1x128xf32>
    %171 = vector.shape_cast %170 : vector<1x1x128xf32> to vector<1x128xf32>
    %172 = vector.shape_cast %169 : vector<1x128xf32> to vector<1x1x128xf32>
    tpu.vector_store %arg13[%c4_97, %c0_98, %c0_99], %172 {strides = array<i32>} : memref<6x1x128xf32, #tpu.memory_space<vmem>>, vector<1x1x128xf32>,
    %c5 = arith.constant 5 : index
    %c0_100 = arith.constant 0 : index
    %c0_101 = arith.constant 0 : index
    %173 = vector.load %arg3[%c5, %c0_100, %c0_101] : memref<6x1x128xf32, #tpu.memory_space<vmem>>, vector<1x1x128xf32>
    %174 = vector.shape_cast %173 : vector<1x1x128xf32> to vector<1x128xf32>
    %c5_102 = arith.constant 5 : index
    %c0_103 = arith.constant 0 : index
    %c0_104 = arith.constant 0 : index
    %175 = vector.load %arg2[%c5_102, %c0_103, %c0_104] : memref<6x1x128xf32, #tpu.memory_space<vmem>>, vector<1x1x128xf32>
    %176 = vector.shape_cast %175 : vector<1x1x128xf32> to vector<1x128xf32>
    %c5_105 = arith.constant 5 : index
    %c0_106 = arith.constant 0 : index
    %c0_107 = arith.constant 0 : index
    %177 = vector.load %arg4[%c5_105, %c0_106, %c0_107] : memref<6x32x1xf32, #tpu.memory_space<vmem>>, vector<1x32x1xf32>
    %178 = vector.shape_cast %177 : vector<1x32x1xf32> to vector<32x1xf32>
    %179 = vector.broadcast %0 : vector<32x1xf32> to vector<32x128xf32>
    %180 = vector.broadcast %174 : vector<1x128xf32> to vector<32x128xf32>
    %181 = arith.mulf %179, %180 : vector<32x128xf32>
    %182 = vector.broadcast %1 : vector<32x1xf32> to vector<32x128xf32>
    %183 = vector.broadcast %176 : vector<1x128xf32> to vector<32x128xf32>
    %184 = arith.mulf %182, %183 : vector<32x128xf32>
    %185 = arith.addf %181, %184 : vector<32x128xf32>
    %186 = vector.broadcast %178 : vector<32x1xf32> to vector<32x128xf32>
    %187 = arith.addf %185, %186 : vector<32x128xf32>
    %cst_108 = arith.constant 0.000000e+00 : f32
    %188 = vector.broadcast %cst_108 : f32 to vector<32x128xf32>
    %189 = arith.maximumf %187, %188 : vector<32x128xf32>
    %cst_109 = arith.constant dense<0.000000e+00> : vector<32x128xf32>
    %190 = tpu.matmul %2, %189, %cst_109 {dimension_numbers = #tpu.dot_dimension_numbers<[1], [0], [0], [1], [0, 0, 1, 1], [], []>} : vector<32x32xf32>, vector<32x128xf32>, vector<32x128xf32> -> vector<32x128xf32>
    %191 = vector.broadcast %3 : vector<32x1xf32> to vector<32x128xf32>
    %192 = arith.addf %190, %191 : vector<32x128xf32>
    %cst_110 = arith.constant 0.000000e+00 : f32
    %193 = vector.broadcast %cst_110 : f32 to vector<32x128xf32>
    %194 = arith.maximumf %192, %193 : vector<32x128xf32>
    %cst_111 = arith.constant dense<0.000000e+00> : vector<32x128xf32>
    %195 = tpu.matmul %4, %194, %cst_111 {dimension_numbers = #tpu.dot_dimension_numbers<[1], [0], [0], [1], [0, 0, 1, 1], [], []>} : vector<32x32xf32>, vector<32x128xf32>, vector<32x128xf32> -> vector<32x128xf32>
    %196 = vector.broadcast %5 : vector<32x1xf32> to vector<32x128xf32>
    %197 = arith.addf %195, %196 : vector<32x128xf32>
    %cst_112 = arith.constant 0.000000e+00 : f32
    %198 = vector.broadcast %cst_112 : f32 to vector<32x128xf32>
    %199 = arith.maximumf %197, %198 : vector<32x128xf32>
    %cst_113 = arith.constant dense<0.000000e+00> : vector<1x128xf32>
    %200 = tpu.matmul %6, %199, %cst_113 {dimension_numbers = #tpu.dot_dimension_numbers<[1], [0], [0], [1], [0, 0, 1, 1], [], []>} : vector<1x32xf32>, vector<32x128xf32>, vector<1x128xf32> -> vector<1x128xf32>
    %201 = vector.broadcast %7 : vector<1x1xf32> to vector<1x128xf32>
    %202 = arith.addf %200, %201 : vector<1x128xf32>
    %c5_114 = arith.constant 5 : index
    %c0_115 = arith.constant 0 : index
    %c0_116 = arith.constant 0 : index
    %203 = vector.load %arg13[%c5_114, %c0_115, %c0_116] : memref<6x1x128xf32, #tpu.memory_space<vmem>>, vector<1x1x128xf32>
    %204 = vector.shape_cast %203 : vector<1x1x128xf32> to vector<1x128xf32>
    %205 = vector.shape_cast %202 : vector<1x128xf32> to vector<1x1x128xf32>
    tpu.vector_store %arg13[%c5_114, %c0_115, %c0_116], %205 {strides = array<i32>} : memref<6x1x128xf32, #tpu.memory_space<vmem>>, vector<1x1x128xf32>,
    return
  }
  func.func @transform_0(%arg0: i32, %arg1: i32) -> (i32, i32, i32) {
    %c0_i32 = arith.constant 0 : i32
    %c0_i32_0 = arith.constant 0 : i32
    return %arg0, %c0_i32, %arg1 : i32, i32, i32
  }
  func.func @transform_1(%arg0: i32, %arg1: i32) -> (i32, i32, i32) {
    %c0_i32 = arith.constant 0 : i32
    %c0_i32_0 = arith.constant 0 : i32
    return %arg0, %c0_i32, %arg1 : i32, i32, i32
  }
  func.func @transform_2(%arg0: i32, %arg1: i32) -> (i32, i32, i32) {
    %c0_i32 = arith.constant 0 : i32
    %c0_i32_0 = arith.constant 0 : i32
    %c0_i32_1 = arith.constant 0 : i32
    return %arg0, %c0_i32, %c0_i32_0 : i32, i32, i32
  }
  func.func @transform_3(%arg0: i32, %arg1: i32) -> (i32, i32) {
    %c0_i32 = arith.constant 0 : i32
    %c0_i32_0 = arith.constant 0 : i32
    %c0_i32_1 = arith.constant 0 : i32
    return %c0_i32, %c0_i32_0 : i32, i32
  }
  func.func @transform_4(%arg0: i32, %arg1: i32) -> (i32, i32) {
    %c0_i32 = arith.constant 0 : i32
    %c0_i32_0 = arith.constant 0 : i32
    %c0_i32_1 = arith.constant 0 : i32
    return %c0_i32, %c0_i32_0 : i32, i32
  }
  func.func @transform_5(%arg0: i32, %arg1: i32) -> (i32, i32) {
    %c0_i32 = arith.constant 0 : i32
    %c0_i32_0 = arith.constant 0 : i32
    %c0_i32_1 = arith.constant 0 : i32
    return %c0_i32, %c0_i32_0 : i32, i32
  }
  func.func @transform_6(%arg0: i32, %arg1: i32) -> (i32, i32) {
    %c0_i32 = arith.constant 0 : i32
    %c0_i32_0 = arith.constant 0 : i32
    %c0_i32_1 = arith.constant 0 : i32
    return %c0_i32, %c0_i32_0 : i32, i32
  }
  func.func @transform_7(%arg0: i32, %arg1: i32) -> (i32, i32) {
    %c0_i32 = arith.constant 0 : i32
    %c0_i32_0 = arith.constant 0 : i32
    %c0_i32_1 = arith.constant 0 : i32
    return %c0_i32, %c0_i32_0 : i32, i32
  }
  func.func @transform_8(%arg0: i32, %arg1: i32) -> (i32, i32) {
    %c0_i32 = arith.constant 0 : i32
    %c0_i32_0 = arith.constant 0 : i32
    %c0_i32_1 = arith.constant 0 : i32
    return %c0_i32, %c0_i32_0 : i32, i32
  }
  func.func @transform_9(%arg0: i32, %arg1: i32) -> (i32, i32) {
    %c0_i32 = arith.constant 0 : i32
    %c0_i32_0 = arith.constant 0 : i32
    %c0_i32_1 = arith.constant 0 : i32
    return %c0_i32, %c0_i32_0 : i32, i32
  }
  func.func @transform_10(%arg0: i32, %arg1: i32) -> (i32, i32) {
    %c0_i32 = arith.constant 0 : i32
    %c0_i32_0 = arith.constant 0 : i32
    %c0_i32_1 = arith.constant 0 : i32
    return %c0_i32, %c0_i32_0 : i32, i32
  }
  func.func @transform_11(%arg0: i32, %arg1: i32) -> (i32, i32, i32) {
    %c0_i32 = arith.constant 0 : i32
    %c0_i32_0 = arith.constant 0 : i32
    return %arg0, %c0_i32, %arg1 : i32, i32, i32
  }
}

</mosaic_0001>

<bundles_post_ra>
// kernel: decoder_forward.1
= control target key start
LH: loop header
LB: loop body
LE: loop exit
PB: predicated region body
PF: predicated region fallthrough
CT: control target
= control target key end

     0   :  { %s3297_s0 = inlined_call_operand.vmem [shape: f32[6,1,128], index: 0, kind: input, shape index: {}]   ;;  %s3298_s1 = inlined_call_operand.vmem [shape: f32[6,1,128], index: 1, kind: input, shape index: {}]   ;;  %s3299_s2 = inlined_call_operand.vmem [shape: f32[6,32,1], index: 2, kind: input, shape index: {}]   ;;  %s3300_s3 = inlined_call_operand.vmem [shape: f32[32,1], index: 3, kind: input, shape index: {}]   ;;  %s3301_s4 = inlined_call_operand.vmem [shape: f32[32,1], index: 4, kind: input, shape index: {}]   ;;  %s3302_s5 = inlined_call_operand.vmem [shape: f32[32,32], index: 5, kind: input, shape index: {}]   ;;  %s3303_s6 = inlined_call_operand.vmem [shape: f32[32,1], index: 6, kind: input, shape index: {}]   ;;  %s3304_s7 = inlined_call_operand.vmem [shape: f32[32,32], index: 7, kind: input, shape index: {}]   ;;  %s3305_s8 = inlined_call_operand.vmem [shape: f32[32,1], index: 8, kind: input, shape index: {}]   ;;  %s3306_s9 = inlined_call_operand.vmem [shape: f32[1,32], index: 9, kind: input, shape index: {}]   ;;  %s3307_s10 = inlined_call_operand.<no memory space> [shape: f32[1,1], index: 10, kind: input, shape index: {}]   ;;  %s3308_s11 = inlined_call_operand.hbm [shape: f32[6,1,128], index: 11, kind: output, shape index: {}]  }
   0x1   :  { %v16_v0 = vstv %s3307_s10 }
   0x2   :  { %17 = vst [vmem:[#allocation2] sm:$0x1] %v16_v0 }
   0x3   :  { %v45_v1 = vld [vmem:[%s3301_s4] sm:$0xff]  ;;  %v2683_v3 = vmov 0   ;;  %v46_v4 = vld [vmem:[%s3301_s4 + $0x8] sm:$0xff]  ;;  %v44_v6 = vld [vmem:[%s3300_s3 + $0x18] sm:$0xff] }
   0x4   :  { %v41_v2 = vld [vmem:[%s3300_s3] sm:$0xff]  ;;  %2658 = vset.pattern.permute.xlu1 %v2683_v3  ;;  %2657 = vset.pattern.permute.xlu0 %v2683_v3  ;;  %v42_v5 = vld [vmem:[%s3300_s3 + $0x8] sm:$0xff]  ;;  %v43_v7 = vld [vmem:[%s3300_s3 + $0x10] sm:$0xff] }
   0x5   :  { %105 = vperm.xlu1 %2658, %v45_v1   ;;  %75 = vperm.xlu0 %2657, %v41_v2   ;;  %v48_v8 = vld [vmem:[%s3301_s4 + $0x18] sm:$0xff]  ;;  %v47_v9 = vld [vmem:[%s3301_s4 + $0x10] sm:$0xff]  ;;  %v70_v10 = vld [vmem:[%s3299_s2 + $0x8] sm:$0xff] }
   0x6   :  { %v69_v11 = vld [vmem:[%s3299_s2] sm:$0xff] }
   0x9   :  { %110 = vperm.xlu1 %2658, %v46_v4   ;;  %80 = vperm.xlu0 %2657, %v42_v5  }
   0xd   :  { %90 = vperm.xlu1 %2658, %v44_v6   ;;  %85 = vperm.xlu0 %2657, %v43_v7  }
  0x11   :  { %120 = vperm.xlu1 %2658, %v48_v8   ;;  %115 = vperm.xlu0 %2657, %v47_v9  }
  0x12   :  { %18 = vsyncpa [#allocation4], 0  ;;  %v72_v12 = vld [vmem:[%s3299_s2 + $0x18] sm:$0xff]  ;;  %v71_v13 = vld [vmem:[%s3299_s2 + $0x10] sm:$0xff]  ;;  %vm185_vm0 = vcmask 261120   ;;  %vm2685_vm1 = vmmov 0  }
  0x13   :  { %v54_v14 = vld [vmem:[%s3303_s6 + $0x8] sm:$0xff]  ;;  %v53_v15 = vld [vmem:[%s3303_s6] sm:$0xff]  ;;  %v56_v16 = vld [vmem:[%s3303_s6 + $0x18] sm:$0xff] }
  0x14   :  { %v55_v17 = vld [vmem:[%s3303_s6 + $0x10] sm:$0xff]  ;;  %v2804_v18 = vld [vmem:[%s3302_s5] sm:$0xff]  ;;  %v2076_v19 = vld [vmem:[%s3299_s2 + $0x28] sm:$0xff] }
  0x15   :  { %144 = vperm.xlu1 %2658, %v70_v10   ;;  %139 = vperm.xlu0 %2657, %v69_v11   ;;  %v2075_v20 = vld [vmem:[%s3299_s2 + $0x20] sm:$0xff]  ;;  %v2078_v21 = vld [vmem:[%s3299_s2 + $0x38] sm:$0xff]  ;;  %v2077_v22 = vld [vmem:[%s3299_s2 + $0x30] sm:$0xff] }
  0x16   :  { %2292 = vmatprep.mubr.msk.f32.mxu0 %vm185_vm0, %v2804_v18  ;;  %v62_v23 = vld [vmem:[%s3305_s8 + $0x8] sm:$0xff]  ;;  %v61_v24 = vld [vmem:[%s3305_s8] sm:$0xff]  ;;  %v64_v25 = vld [vmem:[%s3305_s8 + $0x18] sm:$0xff] }
  0x17   :  { %v63_v26 = vld [vmem:[%s3305_s8 + $0x10] sm:$0xff]  ;;  %v2093_v27 = vld [vmem:[%s3299_s2 + $0x48] sm:$0xff]  ;;  %v2092_v28 = vld [vmem:[%s3299_s2 + $0x40] sm:$0xff] }
  0x18   :  { %v2095_v29 = vld [vmem:[%s3299_s2 + $0x58] sm:$0xff]  ;;  %v2094_v30 = vld [vmem:[%s3299_s2 + $0x50] sm:$0xff]  ;;  %v2110_v31 = vld [vmem:[%s3299_s2 + $0x68] sm:$0xff] }
  0x19   :  { %154 = vperm.xlu1 %2658, %v72_v12   ;;  %149 = vperm.xlu0 %2657, %v71_v13   ;;  %v2109_v32 = vld [vmem:[%s3299_s2 + $0x60] sm:$0xff]  ;;  %v2112_v33 = vld [vmem:[%s3299_s2 + $0x78] sm:$0xff]  ;;  %v2111_v34 = vld [vmem:[%s3299_s2 + $0x70] sm:$0xff] }
  0x1a   :  { %v2127_v35 = vld [vmem:[%s3299_s2 + $0x88] sm:$0xff]  ;;  %v2126_v36 = vld [vmem:[%s3299_s2 + $0x80] sm:$0xff]  ;;  %v2129_v37 = vld [vmem:[%s3299_s2 + $0x98] sm:$0xff] }
  0x1b   :  { %v2128_v38 = vld [vmem:[%s3299_s2 + $0x90] sm:$0xff]  ;;  %v2144_v39 = vld [vmem:[%s3299_s2 + $0xa8] sm:$0xff]  ;;  %v2143_v40 = vld [vmem:[%s3299_s2 + $0xa0] sm:$0xff] }
  0x1c   :  { %v2146_v41 = vld [vmem:[%s3299_s2 + $0xb8] sm:$0xff]  ;;  %v2145_v42 = vld [vmem:[%s3299_s2 + $0xb0] sm:$0xff]  ;;  %v66_v43 = vld [vmem:[#allocation2] sm:$0x1] }
  0x1d   :  { %172 = vperm.xlu1 %2658, %v54_v14   ;;  %167 = vperm.xlu0 %2657, %v53_v15   ;;  %v2062_v44 = vld [vmem:[%s3298_s1] ss:$0 sm:$0xff]  ;;  %v2079_v46 = vld [vmem:[%s3298_s1 + $0x1] ss:$0 sm:$0xff]  ;;  %v2096_v48 = vld [vmem:[%s3298_s1 + $0x2] ss:$0 sm:$0xff] }
  0x1e   :  { %v2886_v45 = vld [vmem:[%s3297_s0] ss:$0 sm:$0xff]  ;;  %v2894_v47 = vld [vmem:[%s3297_s0 + $0x1] ss:$0 sm:$0xff]  ;;  %v2902_v49 = vld [vmem:[%s3297_s0 + $0x2] ss:$0 sm:$0xff] }
  0x1f   :  { %v2113_v50 = vld [vmem:[%s3298_s1 + $0x3] ss:$0 sm:$0xff]  ;;  %v2130_v58 = vld [vmem:[%s3298_s1 + $0x4] ss:$0 sm:$0xff]  ;;  %v2147_v8 = vld [vmem:[%s3298_s1 + $0x5] ss:$0 sm:$0xff] }
  0x20   :  { %v2910_v51 = vld [vmem:[%s3297_s0 + $0x3] ss:$0 sm:$0xff]  ;;  %v2920_v59 = vld [vmem:[%s3297_s0 + $0x4] ss:$0 sm:$0xff]  ;;  %v2148_v13 = vld [vmem:[%s3297_s0 + $0x5] ss:$0 sm:$0xff] }
  0x21   :  { %182 = vperm.xlu1 %2658, %v56_v16   ;;  %177 = vperm.xlu0 %2657, %v55_v17  }
  0x25   :  { %531 = vperm.xlu1 %2658, %v2076_v19   ;;  %526 = vperm.xlu0 %2657, %v2075_v20  }
  0x29   :  { %541 = vperm.xlu1 %2658, %v2078_v21   ;;  %536 = vperm.xlu0 %2657, %v2077_v22  }
  0x2d   :  { %294 = vperm.xlu1 %2658, %v62_v23   ;;  %289 = vperm.xlu0 %2657, %v61_v24  }
  0x31   :  { %304 = vperm.xlu1 %2658, %v64_v25   ;;  %299 = vperm.xlu0 %2657, %v63_v26  }
  0x35   :  { %842 = vperm.xlu1 %2658, %v2093_v27   ;;  %837 = vperm.xlu0 %2657, %v2092_v28  }
  0x39   :  { %852 = vperm.xlu1 %2658, %v2095_v29   ;;  %847 = vperm.xlu0 %2657, %v2094_v30  }
  0x3d   :  { %1153 = vperm.xlu1 %2658, %v2110_v31   ;;  %1148 = vperm.xlu0 %2657, %v2109_v32  }
  0x41   :  { %1163 = vperm.xlu1 %2658, %v2112_v33   ;;  %1158 = vperm.xlu0 %2657, %v2111_v34  }
  0x45   :  { %1464 = vperm.xlu1 %2658, %v2127_v35   ;;  %1459 = vperm.xlu0 %2657, %v2126_v36  }
  0x49   :  { %1474 = vperm.xlu1 %2658, %v2129_v37   ;;  %1469 = vperm.xlu0 %2657, %v2128_v38  }
  0x4d   :  { %1775 = vperm.xlu1 %2658, %v2144_v39   ;;  %1770 = vperm.xlu0 %2657, %v2143_v40  }
  0x51   :  { %1785 = vperm.xlu1 %2658, %v2146_v41   ;;  %1780 = vperm.xlu0 %2657, %v2145_v42  }
  0x55   :  { %410 = vperm.xlu0 %2657, %v66_v43  }
  0x84   :  { %v106_v52 = vpop.permute.xlu1 %105  ;;  %v76_v53 = vpop.permute.xlu0 %75 }
  0x85   :  { %v99_v54 = vmul.f32 %v2062_v44, %v76_v53  ;;  %v129_v55 = vmul.f32 %v2886_v45, %v106_v52  ;;  %v506_v56 = vmul.f32 %v2079_v46, %v76_v53  ;;  %v516_v57 = vmul.f32 %v2894_v47, %v106_v52 }
  0x86   :  { %v817_v60 = vmul.f32 %v2096_v48, %v76_v53  ;;  %v827_v61 = vmul.f32 %v2902_v49, %v106_v52  ;;  %v1128_v62 = vmul.f32 %v2113_v50, %v76_v53  ;;  %v1138_v63 = vmul.f32 %v2910_v51, %v106_v52 }
  0x87   :  { %v2924_v0 = vadd.f32 %v129_v55, %v99_v54  ;;  %v2926_v1 = vadd.f32 %v516_v57, %v506_v56  ;;  %v1439_v6 = vmul.f32 %v2130_v58, %v76_v53  ;;  %v1449_v7 = vmul.f32 %v2920_v59, %v106_v52 }
  0x88   :  { %v111_v2 = vpop.permute.xlu1 %110  ;;  %v81_v3 = vpop.permute.xlu0 %80  ;;  %v2928_v4 = vadd.f32 %v827_v61, %v817_v60  ;;  %v2930_v5 = vadd.f32 %v1138_v63, %v1128_v62  ;;  %v1750_v22 = vmul.f32 %v2147_v8, %v76_v53  ;;  %v1760_v28 = vmul.f32 %v2148_v13, %v106_v52 }
  0x89   :  { %v130_v9 = vmul.f32 %v2886_v45, %v111_v2  ;;  %v100_v10 = vmul.f32 %v2062_v44, %v81_v3  ;;  %v517_v11 = vmul.f32 %v2894_v47, %v111_v2  ;;  %v507_v12 = vmul.f32 %v2079_v46, %v81_v3 }
  0x8a   :  { %v828_v14 = vmul.f32 %v2902_v49, %v111_v2  ;;  %v818_v15 = vmul.f32 %v2096_v48, %v81_v3  ;;  %v1139_v16 = vmul.f32 %v2910_v51, %v111_v2  ;;  %v1129_v17 = vmul.f32 %v2113_v50, %v81_v3 }
  0x8b   :  { %v2943_v19 = vadd.f32 %v517_v11, %v507_v12  ;;  %v1450_v20 = vmul.f32 %v2920_v59, %v111_v2  ;;  %v1440_v21 = vmul.f32 %v2130_v58, %v81_v3  ;;  %v2950_v27 = vadd.f32 %v1449_v7, %v1439_v6 }
  0x8c   :  { %v91_v23 = vpop.permute.xlu1 %90  ;;  %v86_v24 = vpop.permute.xlu0 %85  ;;  %v2946_v25 = vadd.f32 %v828_v14, %v818_v15  ;;  %v2948_v26 = vadd.f32 %v1139_v16, %v1129_v17  ;;  %v134_v29 = vadd.f32 %v130_v9, %v100_v10  ;;  %v1761_v32 = vmul.f32 %v2148_v13, %v111_v2 }
  0x8d   :  { %v102_v30 = vmul.f32 %v2062_v44, %v91_v23  ;;  %v101_v31 = vmul.f32 %v2062_v44, %v86_v24  ;;  %v509_v33 = vmul.f32 %v2079_v46, %v91_v23  ;;  %v508_v34 = vmul.f32 %v2079_v46, %v86_v24 }
  0x8e   :  { %v820_v35 = vmul.f32 %v2096_v48, %v91_v23  ;;  %v819_v36 = vmul.f32 %v2096_v48, %v86_v24  ;;  %v1131_v37 = vmul.f32 %v2113_v50, %v91_v23  ;;  %v1130_v38 = vmul.f32 %v2113_v50, %v86_v24 }
  0x8f   :  { %v2952_v39 = vadd.f32 %v1450_v20, %v1440_v21  ;;  %v1442_v40 = vmul.f32 %v2130_v58, %v91_v23  ;;  %v1441_v43 = vmul.f32 %v2130_v58, %v86_v24  ;;  %v1751_v53 = vmul.f32 %v2147_v8, %v81_v3 }
  0x90   :  { %v121_v41 = vpop.permute.xlu1 %120  ;;  %v116_v42 = vpop.permute.xlu0 %115  ;;  %v2954_v54 = vadd.f32 %v1760_v28, %v1750_v22  ;;  %v1753_v52 = vmul.f32 %v2147_v8, %v91_v23  ;;  %v1752_v63 = vmul.f32 %v2147_v8, %v86_v24 }
  0x91   :  { %v132_v55 = vmul.f32 %v2886_v45, %v121_v41  ;;  %v131_v44 = vmul.f32 %v2886_v45, %v116_v42  ;;  %v519_v46 = vmul.f32 %v2894_v47, %v121_v41  ;;  %v518_v48 = vmul.f32 %v2894_v47, %v116_v42 }
  0x92   :  { %v830_v50 = vmul.f32 %v2902_v49, %v121_v41  ;;  %v829_v56 = vmul.f32 %v2902_v49, %v116_v42  ;;  %v1141_v57 = vmul.f32 %v2910_v51, %v121_v41  ;;  %v1140_v58 = vmul.f32 %v2910_v51, %v116_v42 }
  0x93   :  { %v136_v60 = vadd.f32 %v132_v55, %v102_v30  ;;  %v523_v61 = vadd.f32 %v519_v46, %v509_v33  ;;  %v522_v62 = vadd.f32 %v518_v48, %v508_v34  ;;  %v1452_v10 = vmul.f32 %v2920_v59, %v121_v41 }
  0x94   :  { %v145_v2 = vpop.permute.xlu1 %144  ;;  %v140_v3 = vpop.permute.xlu0 %139  ;;  %v2964_v6 = vadd.f32 %v830_v50, %v820_v35  ;;  %v2966_v45 = vadd.f32 %v829_v56, %v819_v36  ;;  %v2968_v7 = vadd.f32 %v1141_v57, %v1131_v37  ;;  %v2970_v47 = vadd.f32 %v1140_v58, %v1130_v38  ;;  %v2996_v35 = vld [vmem:[%s3302_s5 + $0x8] sm:$0xff]  ;;  %v3001_v36 = vld [vmem:[%s3302_s5 + $0x10] sm:$0xff] }
  0x95   :  { %v158_v9 = vadd.f32 %v145_v2, %v134_v29  ;;  %v157_v49 = vadd.f32 %v140_v3, %v2924_v0  ;;  %v1451_v51 = vmul.f32 %v2920_v59, %v116_v42  ;;  %v135_v11 = vadd.f32 %v131_v44, %v101_v31 }
  0x96   :  { %v2975_v12 = vadd.f32 %v1761_v32, %v1751_v53  ;;  %v1763_v8 = vmul.f32 %v2148_v13, %v121_v41  ;;  %v1762_v14 = vmul.f32 %v2148_v13, %v116_v42  ;;  %v2977_v17 = vadd.f32 %v1452_v10, %v1442_v40  ;;  %v3010_v40 = vld [vmem:[%s3302_s5 + $0x18] sm:$0xff] }
  0x97   :  { %v162_v15 = vmax.f32 %v158_v9, 0.0  ;;  %v161_v16 = vmax.f32 %v157_v49, 0.0  ;;  %v2979_v20 = vadd.f32 %v1451_v51, %v1441_v43 }
  0x98   :  { %v155_v21 = vpop.permute.xlu1 %154  ;;  %v150_v22 = vpop.permute.xlu0 %149  ;;  %v2981_v23 = vadd.f32 %v1763_v8, %v1753_v52  ;;  %v2983_v0 = vadd.f32 %v1762_v14, %v1752_v63 }
  0x99   :  { %v160_v24 = vadd.f32 %v155_v21, %v136_v60  ;;  %v159_v28 = vadd.f32 %v150_v22, %v135_v11  ;;  %v2518_v59 = vpack.c.bf16 %v162_v15, %v161_v16 }
  0x9b   :  { %v164_v29 = vmax.f32 %v160_v24, 0.0  ;;  %v163_v30 = vmax.f32 %v159_v28, 0.0  ;;  %2519 = vmatprep.subr.bf16.mxu0 %v2518_v59 }
  0x9c   :  { %v2985_v31 = vpop.permute.xlu1 %172  ;;  %2521 = vmatpush3.bf16.msra.mxu0 %v2518_v59  ;;  %v2987_v13 = vpop.permute.xlu0 %167 }
  0x9d   :  { %v2522_v32 = vpack.c.bf16 %v164_v29, %v163_v30 }
  0x9f   :  { %2523 = vmatprep.subr.bf16.mxu0 %v2522_v32 }
  0xa0   :  { %v2989_v33 = vpop.permute.xlu1 %182  ;;  %2525 = vmatpush3.bf16.msra.mxu0 %v2522_v32  ;;  %v2991_v34 = vpop.permute.xlu0 %177 }
  0xa3   :  { %2293 = vmatmul.mubr.msk.f32.vlgmr.msra.gmra.mrb[0].mxu0 %vm185_vm0, %v2996_v35 }
  0xa4   :  { %v532_v37 = vpop.permute.xlu1 %531  ;;  %v527_v38 = vpop.permute.xlu0 %526  ;;  %2295 = vmatprep.mubr.msk.f32.mxu0 %vm185_vm0, %v3001_v36 }
  0xa5   :  { %v545_v41 = vadd.f32 %v532_v37, %v2943_v19  ;;  %v544_v42 = vadd.f32 %v527_v38, %v2926_v1 }
  0xa7   :  { %v549_v43 = vmax.f32 %v545_v41, 0.0  ;;  %v548_v53 = vmax.f32 %v544_v42, 0.0  ;;  %2296 = vmatmul.mubr.msk.f32.gmra.mrb[2].mxu0 %vm185_vm0, %v3010_v40 }
  0xa8   :  { %v542_v52 = vpop.permute.xlu1 %541  ;;  %v537_v55 = vpop.permute.xlu0 %536 }
  0xa9   :  { %v3016_v44 = vpack.c.bf16 %v549_v43, %v548_v53  ;;  %v547_v46 = vadd.f32 %v542_v52, %v523_v61  ;;  %v546_v48 = vadd.f32 %v537_v55, %v522_v62 }
  0xab   :  { %v551_v50 = vmax.f32 %v547_v46, 0.0  ;;  %v550_v56 = vmax.f32 %v546_v48, 0.0 }
  0xac   :  { %v3018_v57 = vpop.permute.xlu1 %294  ;;  %v3020_v58 = vpop.permute.xlu0 %289 }
  0xad   :  { %v3022_v19 = vpack.c.bf16 %v551_v50, %v550_v56 }
  0xb0   :  { %v3024_v1 = vpop.permute.xlu1 %304  ;;  %v3026_v60 = vpop.permute.xlu0 %299 }
  0xb4   :  { %v843_v63 = vpop.permute.xlu1 %842  ;;  %v838_v2 = vpop.permute.xlu0 %837 }
  0xb5   :  { %v856_v3 = vadd.f32 %v843_v63, %v2946_v25  ;;  %v855_v9 = vadd.f32 %v838_v2, %v2928_v4 }
  0xb7   :  { %v860_v61 = vmax.f32 %v856_v3, 0.0  ;;  %v859_v62 = vmax.f32 %v855_v9, 0.0 }
  0xb8   :  { %v853_v49 = vpop.permute.xlu1 %852  ;;  %v848_v10 = vpop.permute.xlu0 %847 }
  0xb9   :  { %v3030_v51 = vpack.c.bf16 %v860_v61, %v859_v62  ;;  %v858_v11 = vadd.f32 %v853_v49, %v2964_v6  ;;  %v857_v8 = vadd.f32 %v848_v10, %v2966_v45 }
  0xbb   :  { %v862_v14 = vmax.f32 %v858_v11, 0.0  ;;  %v861_v15 = vmax.f32 %v857_v8, 0.0 }
  0xbc   :  { %v1154_v16 = vpop.permute.xlu1 %1153  ;;  %v1149_v21 = vpop.permute.xlu0 %1148 }
  0xbd   :  { %v3034_v22 = vpack.c.bf16 %v862_v14, %v861_v15  ;;  %v1167_v25 = vadd.f32 %v1154_v16, %v2948_v26  ;;  %v1166_v4 = vadd.f32 %v1149_v21, %v2930_v5 }
  0xbf   :  { %v1171_v24 = vmax.f32 %v1167_v25, 0.0  ;;  %v1170_v28 = vmax.f32 %v1166_v4, 0.0 }
  0xc0   :  { %v1164_v59 = vpop.permute.xlu1 %1163  ;;  %v1159_v29 = vpop.permute.xlu0 %1158 }
  0xc1   :  { %v3038_v30 = vpack.c.bf16 %v1171_v24, %v1170_v28  ;;  %v1169_v6 = vadd.f32 %v1164_v59, %v2968_v7  ;;  %v1168_v45 = vadd.f32 %v1159_v29, %v2970_v47 }
  0xc3   :  { %v1173_v32 = vmax.f32 %v1169_v6, 0.0  ;;  %v1172_v37 = vmax.f32 %v1168_v45, 0.0  ;;  %v3074_v45 = vld [vmem:[%s3304_s7 + $0x8] sm:$0xff] }
  0xc4   :  { %v1465_v38 = vpop.permute.xlu1 %1464  ;;  %v1460_v41 = vpop.permute.xlu0 %1459 }
  0xc5   :  { %v3042_v42 = vpack.c.bf16 %v1173_v32, %v1172_v37  ;;  %v1478_v26 = vadd.f32 %v1465_v38, %v2952_v39  ;;  %v1477_v5 = vadd.f32 %v1460_v41, %v2950_v27  ;;  %v3080_v32 = vld [vmem:[%s3304_s7 + $0x10] sm:$0xff]  ;;  %v3090_v37 = vld [vmem:[%s3304_s7 + $0x18] sm:$0xff]  ;;  %v2686_v38 = vmov 0.0  }
  0xc6   :  { %2320 = vmatprep.mubr.msk.f32.mxu0 %vm2685_vm1, %v2686_v38 }
  0xc7   :  { %v1482_v43 = vmax.f32 %v1478_v26, 0.0  ;;  %v1481_v53 = vmax.f32 %v1477_v5, 0.0 }
  0xc8   :  { %v1475_v52 = vpop.permute.xlu1 %1474  ;;  %v1470_v55 = vpop.permute.xlu0 %1469 }
  0xc9   :  { %v3046_v46 = vpack.c.bf16 %v1482_v43, %v1481_v53  ;;  %v1480_v7 = vadd.f32 %v1475_v52, %v2977_v17  ;;  %v1479_v47 = vadd.f32 %v1470_v55, %v2979_v20 }
  0xcb   :  { %v1484_v48 = vmax.f32 %v1480_v7, 0.0  ;;  %v1483_v50 = vmax.f32 %v1479_v47, 0.0 }
  0xcc   :  { %v1776_v56 = vpop.permute.xlu1 %1775  ;;  %v1771_v63 = vpop.permute.xlu0 %1770 }
  0xcd   :  { %v3050_v2 = vpack.c.bf16 %v1484_v48, %v1483_v50  ;;  %v1789_v39 = vadd.f32 %v1776_v56, %v2975_v12  ;;  %v1788_v27 = vadd.f32 %v1771_v63, %v2954_v54  ;;  %v3063_v12 = vld [vmem:[%s3304_s7] sm:$0xff] }
  0xce   :  { %2306 = vmatprep.mubr.msk.f32.mxu1 %vm185_vm0, %v3063_v12 }
  0xcf   :  { %v1793_v3 = vmax.f32 %v1789_v39, 0.0  ;;  %v1792_v9 = vmax.f32 %v1788_v27, 0.0 }
  0xd0   :  { %v1786_v61 = vpop.permute.xlu1 %1785  ;;  %v1781_v62 = vpop.permute.xlu0 %1780 }
  0xd1   :  { %v3054_v49 = vpack.c.bf16 %v1793_v3, %v1792_v9  ;;  %v1791_v17 = vadd.f32 %v1786_v61, %v2981_v23  ;;  %v1790_v20 = vadd.f32 %v1781_v62, %v2983_v0 }
  0xd3   :  { %v1795_v10 = vmax.f32 %v1791_v17, 0.0  ;;  %v1794_v11 = vmax.f32 %v1790_v20, 0.0  ;;  %v3120_v20 = vld [vmem:[%s3306_s9] sm:$0x1]  ;;  %s2687_s9 = smov [#allocation3]  }
  0xd4   :  { %s2051_s19 = sshll.u32 %s2687_s9, 4  ;;  %s2052_s19 = int_to_ptr.vmem [resolvable:$true] %s2051_s19 }
  0xd5   :  { %v3058_v8 = vpack.c.bf16 %v1795_v10, %v1794_v11  ;;  %s2659_s20 = scalar_lea.vmem %s2052_s19, 96  ;;  %p2664_p1 = scmp.lt.s32.totalorder %s2052_s19, %s2052_s19 }
  0xd6   :  { %p2660_p0 = scmp.ne.s32.totalorder %s2052_s19, %s2659_s20  ;;  %p2665_p2 = scmp.lt.s32.totalorder %s2659_s20, %s2659_s20 }
  0xd8   :  { %p2666_p3 = por %p2665_p2, %p2664_p1 }
  0xda   :  { %p2667_p4 = pnand %p2666_p3, %p2660_p0 }
 0x176   :  { %v2294_v54 = vpop.f32.mrb[0].mxu0 }
 0x177   :  { %v270_v14 = vadd.f32 %v2294_v54, %v2985_v31  ;;  %v264_v15 = vpop.f32.mrb[1].mxu0 }
 0x178   :  { %v265_v23 = vadd.f32 %v264_v15, %v2987_v13 }
 0x179   :  { %v284_v16 = vmax.f32 %v270_v14, 0.0 }
 0x17a   :  { %v283_v0 = vmax.f32 %v265_v23, 0.0  ;;  %v2297_v21 = vpop.f32.mrb[2].mxu0 }
 0x17b   :  { %v280_v25 = vadd.f32 %v2297_v21, %v2989_v33  ;;  %v274_v4 = vpop.f32.mrb[3].mxu0  ;;  %v411_v21 = vpop.permute.xlu0 %410 }
 0x17c   :  { %v275_v24 = vadd.f32 %v274_v4, %v2991_v34  ;;  %v2526_v28 = vpack.c.bf16 %v284_v16, %v283_v0 }
 0x17d   :  { %v286_v59 = vmax.f32 %v280_v25, 0.0 }
 0x17e   :  { %v285_v29 = vmax.f32 %v275_v24, 0.0  ;;  %2527 = vmatprep.subr.bf16.mxu1 %v2526_v28 }
 0x17f   :  { %2529 = vmatpush3.bf16.msra.mxu1 %v2526_v28 }
 0x180   :  { %v2530_v6 = vpack.c.bf16 %v286_v59, %v285_v29 }
 0x182   :  { %2531 = vmatprep.subr.bf16.mxu1 %v2530_v6 }
 0x183   :  { %2533 = vmatpush3.bf16.msra.mxu1 %v2530_v6 }
 0x184   :  { %2541 = vmatprep.subr.bf16.mxu1 %v3016_v44 }
 0x186   :  { %2307 = vmatmul.mubr.msk.f32.vlgmr.msra.gmra.mrb[0].mxu1 %vm185_vm0, %v3074_v45 }
 0x187   :  { %2543 = vmatpush3.bf16.msra.mxu1 %v3016_v44  ;;  %2309 = vmatprep.mubr.msk.f32.mxu1 %vm185_vm0, %v3080_v32  ;;  %v2684_v44 = vmov 0.0|0.0  }
 0x188   :  { %2545 = vmatprep.subr.bf16.mxu1 %v3022_v19  ;;  %2534 = vmatprep.subr.bf16.mxu0 %v2684_v44 }
 0x18a   :  { %2310 = vmatmul.mubr.msk.f32.gmra.mrb[2].mxu1 %vm185_vm0, %v3090_v37 }
 0x18b   :  { %2547 = vmatpush3.bf16.msra.mxu1 %v3022_v19  ;;  %2331 = vmatprep.mubr.msk.f32.mxu1 %vm185_vm0, %v2804_v18 }
 0x18c   :  { %2556 = vmatprep.subr.bf16.mxu1 %v2684_v44 }
 0x18e   :  { %2332 = vmatmul.mubr.msk.f32.vlgmr.msra.gmra.mrb[4].mxu1 %vm185_vm0, %v2996_v35 }
 0x18f   :  { %2334 = vmatprep.mubr.msk.f32.mxu1 %vm185_vm0, %v3001_v36 }
 0x192   :  { %2335 = vmatmul.mubr.msk.f32.gmra.mrb[6].mxu1 %vm185_vm0, %v3010_v40 }
 0x193   :  { %2359 = vmatprep.mubr.msk.f32.mxu1 %vm2685_vm1, %v2686_v38 }
 0x259   :  { %v2308_v19 = vpop.f32.mrb[0].mxu1 }
 0x25a   :  { %v391_v41 = vadd.f32 %v2308_v19, %v3018_v57  ;;  %v385_v26 = vpop.f32.mrb[1].mxu1 }
 0x25b   :  { %v386_v5 = vadd.f32 %v385_v26, %v3020_v58 }
 0x25c   :  { %v405_v43 = vmax.f32 %v391_v41, 0.0 }
 0x25d   :  { %v404_v53 = vmax.f32 %v386_v5, 0.0  ;;  %v2311_v52 = vpop.f32.mrb[2].mxu1 }
 0x25e   :  { %v401_v55 = vadd.f32 %v2311_v52, %v3024_v1  ;;  %v395_v7 = vpop.f32.mrb[3].mxu1 }
 0x25f   :  { %v2535_v47 = vpack.c.bf16 %v405_v43, %v404_v53  ;;  %v396_v48 = vadd.f32 %v395_v7, %v3026_v60 }
 0x260   :  { %v407_v50 = vmax.f32 %v401_v55, 0.0 }
 0x261   :  { %v406_v56 = vmax.f32 %v396_v48, 0.0  ;;  %2536 = vmatpush3.bf16.msra.mxu0 %v2535_v47  ;;  %v2333_v63 = vpop.f32.mrb[4].mxu1 }
 0x262   :  { %v624_v39 = vadd.f32 %v2333_v63, %v2985_v31  ;;  %v618_v27 = vpop.f32.mrb[5].mxu1  ;;  %2537 = vmatprep.subr.bf16.mxu0 %v2684_v44 }
 0x263   :  { %v2538_v3 = vpack.c.bf16 %v407_v50, %v406_v56  ;;  %v619_v9 = vadd.f32 %v618_v27, %v2987_v13 }
 0x264   :  { %v638_v61 = vmax.f32 %v624_v39, 0.0 }
 0x265   :  { %v637_v62 = vmax.f32 %v619_v9, 0.0  ;;  %2539 = vmatpush3.bf16.msra.mxu0 %v2538_v3  ;;  %v2336_v17 = vpop.f32.mrb[6].mxu1 }
 0x266   :  { %v634_v10 = vadd.f32 %v2336_v17, %v2989_v33  ;;  %v628_v11 = vpop.f32.mrb[7].mxu1 }
 0x267   :  { %v2548_v54 = vpack.c.bf16 %v638_v61, %v637_v62  ;;  %v629_v14 = vadd.f32 %v628_v11, %v2991_v34 }
 0x268   :  { %v640_v15 = vmax.f32 %v634_v10, 0.0  ;;  %2321 = vmatmul.mubr.msk.f32.vlgmr.msra.gmra.mrb[4].mxu0 %vm185_vm0, %v3120_v20 }
 0x269   :  { %v639_v23 = vmax.f32 %v629_v14, 0.0  ;;  %2549 = vmatprep.subr.bf16.mxu0 %v2548_v54  ;;  %2345 = vmatprep.mubr.msk.f32.mxu0 %vm185_vm0, %v3063_v12 }
 0x26a   :  { %2551 = vmatpush3.bf16.msra.mxu0 %v2548_v54 }
 0x26b   :  { %v2552_v16 = vpack.c.bf16 %v640_v15, %v639_v23 }
 0x26d   :  { %2553 = vmatprep.subr.bf16.mxu0 %v2552_v16 }
 0x26e   :  { %2555 = vmatpush3.bf16.msra.mxu0 %v2552_v16 }
 0x26f   :  { %2563 = vmatprep.subr.bf16.mxu0 %v3030_v51 }
 0x271   :  { %2346 = vmatmul.mubr.msk.f32.vlgmr.msra.gmra.mrb[6].mxu0 %vm185_vm0, %v3074_v45 }
 0x272   :  { %2565 = vmatpush3.bf16.msra.mxu0 %v3030_v51  ;;  %2348 = vmatprep.mubr.msk.f32.mxu0 %vm185_vm0, %v3080_v32  ;;  %v413_v51 = vlaneseq }
 0x273   :  { %2567 = vmatprep.subr.bf16.mxu0 %v3034_v22 }
 0x274   :  { %v414_v0 = vshrl.u32 %v413_v51, 7 }
 0x275   :  { %2349 = vmatmul.mubr.msk.f32.gmra.mrb[8].mxu0 %vm185_vm0, %v3090_v37 }
 0x276   :  { %2569 = vmatpush3.bf16.msra.mxu0 %v3034_v22  ;;  %2370 = vmatprep.mubr.msk.f32.mxu0 %vm185_vm0, %v2804_v18  ;;  %v415_v22 = vsub.s32 0, %v414_v0 }
 0x277   :  { %2578 = vmatprep.subr.bf16.mxu0 %v2684_v44 }
 0x278   :  { %v3149_v25 = vrot.slane %v411_v21, %v415_v22 }
 0x279   :  { %2371 = vmatmul.mubr.msk.f32.vlgmr.msra.gmra.mrb[10].mxu0 %vm185_vm0, %v2996_v35 }
 0x27a   :  { %2373 = vmatprep.mubr.msk.f32.mxu0 %vm185_vm0, %v3001_v36 }
 0x27d   :  { %2374 = vmatmul.mubr.msk.f32.gmra.mrb[12].mxu0 %vm185_vm0, %v3010_v40 }
 0x27e   :  { %2398 = vmatprep.mubr.msk.f32.mxu0 %vm2685_vm1, %v2686_v38 }
 0x33b   :  { %v486_v4 = vpop.f32.mrb[4].mxu0 }
 0x33c   :  { %v487_v24 = vadd.f32 %v486_v4, %v3149_v25  ;;  %v2322_v28 = vpop.f32.mrb[5].mxu0 }
 0x33e   :  { %490 = vst [vmem:[#allocation3] sm:$0x1] %v487_v24 }
 0x344   :  { %v2347_v59 = vpop.f32.mrb[6].mxu0 }
 0x345   :  { %v713_v29 = vadd.f32 %v2347_v59, %v3018_v57  ;;  %v707_v6 = vpop.f32.mrb[7].mxu0 }
 0x346   :  { %v708_v19 = vadd.f32 %v707_v6, %v3020_v58 }
 0x347   :  { %v727_v41 = vmax.f32 %v713_v29, 0.0 }
 0x348   :  { %v726_v26 = vmax.f32 %v708_v19, 0.0  ;;  %v2350_v5 = vpop.f32.mrb[8].mxu0 }
 0x349   :  { %v723_v43 = vadd.f32 %v2350_v5, %v3024_v1  ;;  %v717_v53 = vpop.f32.mrb[9].mxu0 }
 0x34a   :  { %v2557_v52 = vpack.c.bf16 %v727_v41, %v726_v26  ;;  %v718_v55 = vadd.f32 %v717_v53, %v3026_v60 }
 0x34b   :  { %v729_v7 = vmax.f32 %v723_v43, 0.0 }
 0x34c   :  { %v728_v47 = vmax.f32 %v718_v55, 0.0  ;;  %2558 = vmatpush3.bf16.msra.mxu1 %v2557_v52  ;;  %v2372_v48 = vpop.f32.mrb[10].mxu0 }
 0x34d   :  { %v935_v50 = vadd.f32 %v2372_v48, %v2985_v31  ;;  %v929_v56 = vpop.f32.mrb[11].mxu0  ;;  %2559 = vmatprep.subr.bf16.mxu1 %v2684_v44 }
 0x34e   :  { %v2560_v63 = vpack.c.bf16 %v729_v7, %v728_v47  ;;  %v930_v39 = vadd.f32 %v929_v56, %v2987_v13 }
 0x34f   :  { %v949_v27 = vmax.f32 %v935_v50, 0.0 }
 0x350   :  { %v948_v3 = vmax.f32 %v930_v39, 0.0  ;;  %2561 = vmatpush3.bf16.msra.mxu1 %v2560_v63  ;;  %v2375_v9 = vpop.f32.mrb[12].mxu0 }
 0x351   :  { %v945_v61 = vadd.f32 %v2375_v9, %v2989_v33  ;;  %v939_v62 = vpop.f32.mrb[13].mxu0 }
 0x352   :  { %v2570_v17 = vpack.c.bf16 %v949_v27, %v948_v3  ;;  %v940_v10 = vadd.f32 %v939_v62, %v2991_v34 }
 0x353   :  { %v951_v11 = vmax.f32 %v945_v61, 0.0  ;;  %2360 = vmatmul.mubr.msk.f32.vlgmr.msra.gmra.mrb[8].mxu1 %vm185_vm0, %v3120_v20 }
 0x354   :  { %v950_v54 = vmax.f32 %v940_v10, 0.0  ;;  %2571 = vmatprep.subr.bf16.mxu1 %v2570_v17  ;;  %2384 = vmatprep.mubr.msk.f32.mxu1 %vm185_vm0, %v3063_v12 }
 0x355   :  { %2573 = vmatpush3.bf16.msra.mxu1 %v2570_v17 }
 0x356   :  { %v2574_v14 = vpack.c.bf16 %v951_v11, %v950_v54 }
 0x358   :  { %2575 = vmatprep.subr.bf16.mxu1 %v2574_v14 }
 0x359   :  { %2577 = vmatpush3.bf16.msra.mxu1 %v2574_v14 }
 0x35a   :  { %2585 = vmatprep.subr.bf16.mxu1 %v3038_v30 }
 0x35c   :  { %2385 = vmatmul.mubr.msk.f32.vlgmr.msra.gmra.mrb[10].mxu1 %vm185_vm0, %v3074_v45 }
 0x35d   :  { %2587 = vmatpush3.bf16.msra.mxu1 %v3038_v30  ;;  %2387 = vmatprep.mubr.msk.f32.mxu1 %vm185_vm0, %v3080_v32 }
 0x35e   :  { %2589 = vmatprep.subr.bf16.mxu1 %v3042_v42 }
 0x360   :  { %2388 = vmatmul.mubr.msk.f32.gmra.mrb[12].mxu1 %vm185_vm0, %v3090_v37 }
 0x361   :  { %2591 = vmatpush3.bf16.msra.mxu1 %v3042_v42  ;;  %2409 = vmatprep.mubr.msk.f32.mxu1 %vm185_vm0, %v2804_v18 }
 0x362   :  { %2600 = vmatprep.subr.bf16.mxu1 %v2684_v44 }
 0x364   :  { %2410 = vmatmul.mubr.msk.f32.vlgmr.msra.gmra.mrb[14].mxu1 %vm185_vm0, %v2996_v35 }
 0x365   :  { %2412 = vmatprep.mubr.msk.f32.mxu1 %vm185_vm0, %v3001_v36 }
 0x368   :  { %2413 = vmatmul.mubr.msk.f32.gmra.mrb[16].mxu1 %vm185_vm0, %v3010_v40 }
 0x369   :  { %2437 = vmatprep.mubr.msk.f32.mxu1 %vm2685_vm1, %v2686_v38 }
 0x426   :  { %v796_v30 = vpop.f32.mrb[8].mxu1 }
 0x427   :  { %v797_v42 = vadd.f32 %v796_v30, %v3149_v25  ;;  %v2361_v15 = vpop.f32.mrb[9].mxu1 }
 0x429   :  { %801 = vst [vmem:[#allocation3 + $0x1] sm:$0x1] %v797_v42 }
 0x42f   :  { %v2386_v23 = vpop.f32.mrb[10].mxu1 }
 0x430   :  { %v1024_v16 = vadd.f32 %v2386_v23, %v3018_v57  ;;  %v1018_v51 = vpop.f32.mrb[11].mxu1 }
 0x431   :  { %v1019_v0 = vadd.f32 %v1018_v51, %v3020_v58 }
 0x432   :  { %v1038_v22 = vmax.f32 %v1024_v16, 0.0 }
 0x433   :  { %v1037_v21 = vmax.f32 %v1019_v0, 0.0  ;;  %v2389_v4 = vpop.f32.mrb[12].mxu1 }
 0x434   :  { %v1034_v24 = vadd.f32 %v2389_v4, %v3024_v1  ;;  %v1028_v28 = vpop.f32.mrb[13].mxu1 }
 0x435   :  { %v2579_v59 = vpack.c.bf16 %v1038_v22, %v1037_v21  ;;  %v1029_v29 = vadd.f32 %v1028_v28, %v3026_v60 }
 0x436   :  { %v1040_v6 = vmax.f32 %v1034_v24, 0.0 }
 0x437   :  { %v1039_v19 = vmax.f32 %v1029_v29, 0.0  ;;  %2580 = vmatpush3.bf16.msra.mxu0 %v2579_v59  ;;  %v2411_v41 = vpop.f32.mrb[14].mxu1 }
 0x438   :  { %v1246_v26 = vadd.f32 %v2411_v41, %v2985_v31  ;;  %v1240_v5 = vpop.f32.mrb[15].mxu1  ;;  %2581 = vmatprep.subr.bf16.mxu0 %v2684_v44 }
 0x439   :  { %v2582_v43 = vpack.c.bf16 %v1040_v6, %v1039_v19  ;;  %v1241_v53 = vadd.f32 %v1240_v5, %v2987_v13 }
 0x43a   :  { %v1260_v52 = vmax.f32 %v1246_v26, 0.0 }
 0x43b   :  { %v1259_v55 = vmax.f32 %v1241_v53, 0.0  ;;  %2583 = vmatpush3.bf16.msra.mxu0 %v2582_v43  ;;  %v2414_v7 = vpop.f32.mrb[16].mxu1 }
 0x43c   :  { %v1256_v47 = vadd.f32 %v2414_v7, %v2989_v33  ;;  %v1250_v48 = vpop.f32.mrb[17].mxu1 }
 0x43d   :  { %v2592_v50 = vpack.c.bf16 %v1260_v52, %v1259_v55  ;;  %v1251_v56 = vadd.f32 %v1250_v48, %v2991_v34 }
 0x43e   :  { %v1262_v63 = vmax.f32 %v1256_v47, 0.0  ;;  %2399 = vmatmul.mubr.msk.f32.vlgmr.msra.gmra.mrb[14].mxu0 %vm185_vm0, %v3120_v20 }
 0x43f   :  { %v1261_v39 = vmax.f32 %v1251_v56, 0.0  ;;  %2593 = vmatprep.subr.bf16.mxu0 %v2592_v50  ;;  %2423 = vmatprep.mubr.msk.f32.mxu0 %vm185_vm0, %v3063_v12 }
 0x440   :  { %2595 = vmatpush3.bf16.msra.mxu0 %v2592_v50 }
 0x441   :  { %v2596_v27 = vpack.c.bf16 %v1262_v63, %v1261_v39 }
 0x443   :  { %2597 = vmatprep.subr.bf16.mxu0 %v2596_v27 }
 0x444   :  { %2599 = vmatpush3.bf16.msra.mxu0 %v2596_v27 }
 0x445   :  { %2607 = vmatprep.subr.bf16.mxu0 %v3046_v46 }
 0x447   :  { %2424 = vmatmul.mubr.msk.f32.vlgmr.msra.gmra.mrb[16].mxu0 %vm185_vm0, %v3074_v45 }
 0x448   :  { %2609 = vmatpush3.bf16.msra.mxu0 %v3046_v46  ;;  %2426 = vmatprep.mubr.msk.f32.mxu0 %vm185_vm0, %v3080_v32 }
 0x449   :  { %2611 = vmatprep.subr.bf16.mxu0 %v3050_v2 }
 0x44b   :  { %2427 = vmatmul.mubr.msk.f32.gmra.mrb[18].mxu0 %vm185_vm0, %v3090_v37 }
 0x44c   :  { %2613 = vmatpush3.bf16.msra.mxu0 %v3050_v2  ;;  %2448 = vmatprep.mubr.msk.f32.mxu0 %vm185_vm0, %v2804_v18 }
 0x44d   :  { %2622 = vmatprep.subr.bf16.mxu0 %v2684_v44 }
 0x44f   :  { %2449 = vmatmul.mubr.msk.f32.vlgmr.msra.gmra.mrb[20].mxu0 %vm185_vm0, %v2996_v35 }
 0x450   :  { %2451 = vmatprep.mubr.msk.f32.mxu0 %vm185_vm0, %v3001_v36 }
 0x453   :  { %2452 = vmatmul.mubr.msk.f32.gmra.mrb[22].mxu0 %vm185_vm0, %v3010_v40 }
 0x454   :  { %2476 = vmatprep.mubr.msk.f32.mxu0 %vm2685_vm1, %v2686_v38 }
 0x511   :  { %v1107_v46 = vpop.f32.mrb[14].mxu0 }
 0x512   :  { %v1108_v2 = vadd.f32 %v1107_v46, %v3149_v25  ;;  %v2400_v3 = vpop.f32.mrb[15].mxu0 }
 0x514   :  { %1112 = vst [vmem:[#allocation3 + $0x2] sm:$0x1] %v1108_v2 }
 0x51a   :  { %v2425_v9 = vpop.f32.mrb[16].mxu0 }
 0x51b   :  { %v1335_v61 = vadd.f32 %v2425_v9, %v3018_v57  ;;  %v1329_v62 = vpop.f32.mrb[17].mxu0 }
 0x51c   :  { %v1330_v17 = vadd.f32 %v1329_v62, %v3020_v58 }
 0x51d   :  { %v1349_v10 = vmax.f32 %v1335_v61, 0.0 }
 0x51e   :  { %v1348_v11 = vmax.f32 %v1330_v17, 0.0  ;;  %v2428_v54 = vpop.f32.mrb[18].mxu0 }
 0x51f   :  { %v1345_v14 = vadd.f32 %v2428_v54, %v3024_v1  ;;  %v1339_v30 = vpop.f32.mrb[19].mxu0 }
 0x520   :  { %v2601_v42 = vpack.c.bf16 %v1349_v10, %v1348_v11  ;;  %v1340_v15 = vadd.f32 %v1339_v30, %v3026_v60 }
 0x521   :  { %v1351_v23 = vmax.f32 %v1345_v14, 0.0 }
 0x522   :  { %v1350_v16 = vmax.f32 %v1340_v15, 0.0  ;;  %2602 = vmatpush3.bf16.msra.mxu1 %v2601_v42  ;;  %v2450_v51 = vpop.f32.mrb[20].mxu0 }
 0x523   :  { %v1557_v0 = vadd.f32 %v2450_v51, %v2985_v31  ;;  %v1551_v22 = vpop.f32.mrb[21].mxu0  ;;  %2603 = vmatprep.subr.bf16.mxu1 %v2684_v44 }
 0x524   :  { %v2604_v21 = vpack.c.bf16 %v1351_v23, %v1350_v16  ;;  %v1552_v4 = vadd.f32 %v1551_v22, %v2987_v13 }
 0x525   :  { %v1571_v24 = vmax.f32 %v1557_v0, 0.0 }
 0x526   :  { %v1570_v28 = vmax.f32 %v1552_v4, 0.0  ;;  %2605 = vmatpush3.bf16.msra.mxu1 %v2604_v21  ;;  %v2453_v59 = vpop.f32.mrb[22].mxu0 }
 0x527   :  { %v1567_v29 = vadd.f32 %v2453_v59, %v2989_v33  ;;  %v1561_v6 = vpop.f32.mrb[23].mxu0 }
 0x528   :  { %v2614_v19 = vpack.c.bf16 %v1571_v24, %v1570_v28  ;;  %v1562_v41 = vadd.f32 %v1561_v6, %v2991_v34 }
 0x529   :  { %v1573_v26 = vmax.f32 %v1567_v29, 0.0  ;;  %2438 = vmatmul.mubr.msk.f32.vlgmr.msra.gmra.mrb[18].mxu1 %vm185_vm0, %v3120_v20 }
 0x52a   :  { %v1572_v5 = vmax.f32 %v1562_v41, 0.0  ;;  %2615 = vmatprep.subr.bf16.mxu1 %v2614_v19  ;;  %2462 = vmatprep.mubr.msk.f32.mxu1 %vm185_vm0, %v3063_v12 }
 0x52b   :  { %2617 = vmatpush3.bf16.msra.mxu1 %v2614_v19 }
 0x52c   :  { %v2618_v43 = vpack.c.bf16 %v1573_v26, %v1572_v5 }
 0x52e   :  { %2619 = vmatprep.subr.bf16.mxu1 %v2618_v43 }
 0x52f   :  { %2621 = vmatpush3.bf16.msra.mxu1 %v2618_v43 }
 0x530   :  { %2629 = vmatprep.subr.bf16.mxu1 %v3054_v49 }
 0x532   :  { %2463 = vmatmul.mubr.msk.f32.vlgmr.msra.gmra.mrb[20].mxu1 %vm185_vm0, %v3074_v45 }
 0x533   :  { %2631 = vmatpush3.bf16.msra.mxu1 %v3054_v49  ;;  %2465 = vmatprep.mubr.msk.f32.mxu1 %vm185_vm0, %v3080_v32 }
 0x534   :  { %2633 = vmatprep.subr.bf16.mxu1 %v3058_v8 }
 0x536   :  { %2466 = vmatmul.mubr.msk.f32.gmra.mrb[22].mxu1 %vm185_vm0, %v3090_v37 }
 0x537   :  { %2635 = vmatpush3.bf16.msra.mxu1 %v3058_v8  ;;  %2487 = vmatprep.mubr.msk.f32.mxu1 %vm185_vm0, %v2804_v18 }
 0x538   :  { %2644 = vmatprep.subr.bf16.mxu1 %v2684_v44 }
 0x53a   :  { %2488 = vmatmul.mubr.msk.f32.vlgmr.msra.gmra.mrb[24].mxu1 %vm185_vm0, %v2996_v35 }
 0x53b   :  { %2490 = vmatprep.mubr.msk.f32.mxu1 %vm185_vm0, %v3001_v36 }
 0x53e   :  { %2491 = vmatmul.mubr.msk.f32.gmra.mrb[26].mxu1 %vm185_vm0, %v3010_v40 }
 0x53f   :  { %2515 = vmatprep.mubr.msk.f32.mxu1 %vm2685_vm1, %v2686_v38 }
 0x5fc   :  { %v1418_v49 = vpop.f32.mrb[18].mxu1 }
 0x5fd   :  { %v1419_v8 = vadd.f32 %v1418_v49, %v3149_v25  ;;  %v2439_v53 = vpop.f32.mrb[19].mxu1 }
 0x5ff   :  { %1423 = vst [vmem:[#allocation3 + $0x3] sm:$0x1] %v1419_v8 }
 0x605   :  { %v2464_v18 = vpop.f32.mrb[20].mxu1 }
 0x606   :  { %v1646_v52 = vadd.f32 %v2464_v18, %v3018_v57  ;;  %v1640_v55 = vpop.f32.mrb[21].mxu1 }
 0x607   :  { %v1641_v35 = vadd.f32 %v1640_v55, %v3020_v58 }
 0x608   :  { %v1660_v7 = vmax.f32 %v1646_v52, 0.0 }
 0x609   :  { %v1659_v47 = vmax.f32 %v1641_v35, 0.0  ;;  %v2467_v36 = vpop.f32.mrb[22].mxu1 }
 0x60a   :  { %v1656_v48 = vadd.f32 %v2467_v36, %v3024_v1  ;;  %v1650_v40 = vpop.f32.mrb[23].mxu1 }
 0x60b   :  { %v2623_v50 = vpack.c.bf16 %v1660_v7, %v1659_v47  ;;  %v1651_v38 = vadd.f32 %v1650_v40, %v3026_v60 }
 0x60c   :  { %v1662_v56 = vmax.f32 %v1656_v48, 0.0 }
 0x60d   :  { %v1661_v63 = vmax.f32 %v1651_v38, 0.0  ;;  %2624 = vmatpush3.bf16.msra.mxu0 %v2623_v50  ;;  %v2489_v39 = vpop.f32.mrb[24].mxu1 }
 0x60e   :  { %v1868_v27 = vadd.f32 %v2489_v39, %v2985_v31  ;;  %v1862_v46 = vpop.f32.mrb[25].mxu1  ;;  %2625 = vmatprep.subr.bf16.mxu0 %v2684_v44 }
 0x60f   :  { %v2626_v2 = vpack.c.bf16 %v1662_v56, %v1661_v63  ;;  %v1863_v3 = vadd.f32 %v1862_v46, %v2987_v13 }
 0x610   :  { %v1882_v9 = vmax.f32 %v1868_v27, 0.0 }
 0x611   :  { %v1881_v61 = vmax.f32 %v1863_v3, 0.0  ;;  %2627 = vmatpush3.bf16.msra.mxu0 %v2626_v2  ;;  %v2492_v62 = vpop.f32.mrb[26].mxu1 }
 0x612   :  { %v1878_v17 = vadd.f32 %v2492_v62, %v2989_v33  ;;  %v1872_v10 = vpop.f32.mrb[27].mxu1 }
 0x613   :  { %v2636_v11 = vpack.c.bf16 %v1882_v9, %v1881_v61  ;;  %v1873_v54 = vadd.f32 %v1872_v10, %v2991_v34 }
 0x614   :  { %v1884_v14 = vmax.f32 %v1878_v17, 0.0  ;;  %2477 = vmatmul.mubr.msk.f32.vlgmr.msra.gmra.mrb[24].mxu0 %vm185_vm0, %v3120_v20 }
 0x615   :  { %v1883_v31 = vmax.f32 %v1873_v54, 0.0  ;;  %2637 = vmatprep.subr.bf16.mxu0 %v2636_v11  ;;  %2501 = vmatprep.mubr.msk.f32.mxu0 %vm185_vm0, %v3063_v12 }
 0x616   :  { %2639 = vmatpush3.bf16.msra.mxu0 %v2636_v11 }
 0x617   :  { %v2640_v13 = vpack.c.bf16 %v1884_v14, %v1883_v31 }
 0x619   :  { %2641 = vmatprep.subr.bf16.mxu0 %v2640_v13 }
 0x61a   :  { %2643 = vmatpush3.bf16.msra.mxu0 %v2640_v13 }
 0x61d   :  { %2502 = vmatmul.mubr.msk.f32.vlgmr.msra.gmra.mrb[26].mxu0 %vm185_vm0, %v3074_v45 }
 0x61e   :  { %2504 = vmatprep.mubr.msk.f32.mxu0 %vm185_vm0, %v3080_v32 }
 0x621   :  { %2505 = vmatmul.mubr.msk.f32.gmra.mrb[28].mxu0 %vm185_vm0, %v3090_v37 }
 0x6e7   :  { %v1729_v33 = vpop.f32.mrb[24].mxu0 }
 0x6e8   :  { %v1730_v34 = vadd.f32 %v1729_v33, %v3149_v25  ;;  %v2478_v30 = vpop.f32.mrb[25].mxu0 }
 0x6ea   :  { %1734 = vst [vmem:[#allocation3 + $0x4] sm:$0x1] %v1730_v34 }
 0x6f0   :  { %v2503_v42 = vpop.f32.mrb[26].mxu0 }
 0x6f1   :  { %v1957_v12 = vadd.f32 %v2503_v42, %v3018_v57  ;;  %v1951_v15 = vpop.f32.mrb[27].mxu0 }
 0x6f2   :  { %v1952_v23 = vadd.f32 %v1951_v15, %v3020_v58 }
 0x6f3   :  { %v1971_v16 = vmax.f32 %v1957_v12, 0.0 }
 0x6f4   :  { %v1970_v51 = vmax.f32 %v1952_v23, 0.0  ;;  %v2506_v45 = vpop.f32.mrb[28].mxu0 }
 0x6f5   :  { %v1967_v0 = vadd.f32 %v2506_v45, %v3024_v1  ;;  %v1961_v32 = vpop.f32.mrb[29].mxu0 }
 0x6f6   :  { %v2645_v22 = vpack.c.bf16 %v1971_v16, %v1970_v51  ;;  %v1962_v37 = vadd.f32 %v1961_v32, %v3026_v60 }
 0x6f7   :  { %v1973_v21 = vmax.f32 %v1967_v0, 0.0 }
 0x6f8   :  { %v1972_v4 = vmax.f32 %v1962_v37, 0.0  ;;  %2646 = vmatpush3.bf16.msra.mxu1 %v2645_v22 }
 0x6f9   :  { %2647 = vmatprep.subr.bf16.mxu1 %v2684_v44 }
 0x6fa   :  { %v2648_v24 = vpack.c.bf16 %v1973_v21, %v1972_v4 }
 0x6fc   :  { %2649 = vmatpush3.bf16.msra.mxu1 %v2648_v24 }
 0x6ff   :  { %2516 = vmatmul.mubr.msk.f32.vlgmr.msra.gmra.mrb[28].mxu1 %vm185_vm0, %v3120_v20 }
 0x7d2   :  { %v2040_v57 = vpop.f32.mrb[28].mxu1 }
 0x7d3   :  { %v2041_v58 = vadd.f32 %v2040_v57, %v3149_v25  ;;  %v2517_v1 = vpop.f32.mrb[29].mxu1 }
 0x7d5   :  { %2045 = vst [vmem:[#allocation3 + $0x5] sm:$0x1] %v2041_v58 }
 0x7d6   :  { %2670 = shalt.err (!%p2667_p4)
}
 0x7d7   :  { %s2671_s22 = scalar_lea.hbm %s3308_s11, 96 }
 0x7d8   :  { %p2672_p5 = scmp.ne.s32.totalorder %s3308_s11, %s2671_s22  ;;  %p2675_p6 = scmp.lt.u32.totalorder %s2671_s22, %s3308_s11 }
 0x7da   :  { %p2677_p7 = pnand %p2675_p6, %p2672_p5 }
 0x7dc   :  { %2680 = shalt.err (!%p2677_p7)
}
 0x7dd   :  { %s2688_s26 = smov 16   ;;  %s2689_s27 = smov 1  }
 0x7de   :  { %2057 = dma.vmem_to_hbm [thread:$0]  %s2052_s19, 96, %s3308_s11, [#allocation4], %s2688_s26, %s2688_s26, %s2689_s27  }
 0x7df   :  { %2681 = dma.done.wait [#allocation4], 96  }
 0x7e0   :  { %2682 = vsyncadd [#allocation4], 4294967200 }
 0x7e1   :  { %2061 = vsyncpa [#allocation4], 1 }

</bundles_post_ra>
